<compile_context>
chip_gen: v6e
topology: v6e:2x2x1
jax: 0.10.0
libtpu: 0.0.40
codegen_flags: <defaults>
</compile_context>

<pallas_src>
import jax
import jax.numpy as jnp
from jax.experimental import pallas as pl
from jax.experimental.pallas import tpu as pltpu


def _mish(x):
    """Mish = x * tanh(softplus(x)); stable softplus via exp/log (EUP-friendly)."""
    sp = jnp.maximum(x, 0.0) + jnp.log(1.0 + jnp.exp(-jnp.abs(x)))
    return x * jnp.tanh(sp)


def _make_res_conv_block_kernel(kernel_size: int, dilation: int):
    total_pad = dilation * (kernel_size - 1)
    pad_left = total_pad // 2  # PyTorch Conv1d(padding='same') convention

    def kernel(x_ref, s1_ref, t1_ref, w1_ref, b1_ref,
               s2_ref, t2_ref, w2_ref, b2_ref, o_ref):
        # One (C, L) batch element per grid step; L is the 128-lane axis.
        x = x_ref[...].astype(jnp.float32)                      # (C, L)
        C, L = x.shape
        c_mid = w1_ref.shape[1]

        # ---- ConvBlock 1: BN (folded, inference) -> Mish -> Conv1d(k, 'same') ----
        a = _mish(x * s1_ref[...] + t1_ref[...])                # (C, L) f32

        col = jax.lax.broadcasted_iota(jnp.int32, (C, L), 1)
        acc = jnp.zeros((c_mid, L), jnp.float32)
        for j in range(kernel_size):                            # static unroll over taps
            off = j * dilation - pad_left                       # tap_j[:, l] = a[:, l + off]
            if off == 0:
                tap = a
            else:
                # XLU lane rotation + mask = zero-padded shift of the activation.
                tap = pltpu.roll(a, (-off) % L, axis=1)
                valid = (col + off >= 0) & (col + off < L)
                tap = jnp.where(valid, tap, 0.0)
            # bf16 operands -> single-pass MXU matmul, f32 accumulation.
            acc = acc + jnp.dot(w1_ref[j], tap.astype(jnp.bfloat16),
                                preferred_element_type=jnp.float32)
        h = acc + b1_ref[...]                                   # (c_mid, L)

        # ---- ConvBlock 2: BN (folded) -> Mish -> Conv1d(kernel_size=1) ----
        a2 = _mish(h * s2_ref[...] + t2_ref[...])               # (c_mid, L)
        y = jnp.dot(w2_ref[...], a2.astype(jnp.bfloat16),
                    preferred_element_type=jnp.float32) + b2_ref[...]   # (C, L)

        # Dropout: identity at inference time.
        # TODO(synk): training-mode dropout (pltpu.prng_seed/prng_random_bits) not implemented.

        o_ref[...] = (x + y).astype(o_ref.dtype)                # residual add

    return kernel


def res_conv_block(x, params, *, kernel_size, dilation, eps=1e-5):
    """Fused ResConvBlock forward (inference).  x: (B, C, L), channels-first."""
    B, C, L = x.shape
    f32 = jnp.float32

    # Fold BatchNorm (running statistics, inference mode) into per-channel scale+shift.
    # TODO(synk): training-mode batch statistics are not implemented (inference BN only).
    def fold_bn(gamma, beta, mean, var):
        inv = gamma.astype(f32) / jnp.sqrt(var.astype(f32) + eps)
        return inv, beta.astype(f32) - mean.astype(f32) * inv

    s1, t1 = fold_bn(*params["bn1"])                   # (C,)
    s2, t2 = fold_bn(*params["bn2"])                   # (C_mid,)
    w1 = params["w1"]                                  # (C_mid, C, K)  PyTorch layout
    c_mid = w1.shape[0]
    # (K, C_mid, C) bf16: per-tap (C_out, C_in) MXU matrices, contraction dim lane-dense.
    w1k = jnp.transpose(w1, (2, 0, 1)).astype(jnp.bfloat16)
    w2 = params["w2"][:, :, 0].astype(jnp.bfloat16)    # (C, C_mid)   (1x1 conv)
    b1 = params["b1"].astype(f32).reshape(c_mid, 1)
    b2 = params["b2"].astype(f32).reshape(C, 1)
    s1 = s1.reshape(C, 1); t1 = t1.reshape(C, 1)
    s2 = s2.reshape(c_mid, 1); t2 = t2.reshape(c_mid, 1)

    def _const_spec(arr):
        n = arr.ndim
        return pl.BlockSpec(arr.shape, lambda b, _n=n: (0,) * _n)

    kernel = _make_res_conv_block_kernel(kernel_size, dilation)

    grid_spec = pltpu.PrefetchScalarGridSpec(
        num_scalar_prefetch=0,
        grid=(B,),                                     # one batch element per grid step
        in_specs=[
            pl.BlockSpec((None, C, L), lambda b: (b, 0, 0)),
            _const_spec(s1), _const_spec(t1), _const_spec(w1k), _const_spec(b1),
            _const_spec(s2), _const_spec(t2), _const_spec(w2), _const_spec(b2),
        ],
        out_specs=pl.BlockSpec((None, C, L), lambda b: (b, 0, 0)),
    )
    return pl.pallas_call(
        kernel,
        out_shape=jax.ShapeDtypeStruct((B, C, L), x.dtype),
        grid_spec=grid_spec,
        compiler_params=pltpu.CompilerParams(
            # Batch axis is independent -> shards across v7x's 2 TensorCores.
            dimension_semantics=("parallel",),
        ),
    )(x, s1, t1, w1k, b1, s2, t2, w2, b2)


def reference(x, params, *, kernel_size, dilation, eps=1e-5):
    """Pure-JAX reference for ResConvBlock.forward (inference)."""
    f32 = jnp.float32

    def bn(v, gamma, beta, mean, var):
        inv = gamma.astype(f32) / jnp.sqrt(var.astype(f32) + eps)
        return ((v - mean.astype(f32)[None, :, None]) * inv[None, :, None]
                + beta.astype(f32)[None, :, None])

    total_pad = dilation * (kernel_size - 1)
    pad_left = total_pad // 2

    def conv1d(v, w, b, dil, pads):
        # bf16 operands / f32 accumulation, mirroring the kernel's MXU usage.
        out = jax.lax.conv_general_dilated(
            v.astype(jnp.bfloat16), w.astype(jnp.bfloat16),
            window_strides=(1,), padding=[pads], rhs_dilation=(dil,),
            dimension_numbers=("NCH", "OIH", "NCH"),
            preferred_element_type=f32)
        return out + b.astype(f32)[None, :, None]

    xf = x.astype(f32)
    a = _mish(bn(xf, *params["bn1"]))
    h = conv1d(a, params["w1"], params["b1"], dilation,
               (pad_left, total_pad - pad_left))
    a2 = _mish(bn(h, *params["bn2"]))
    y = conv1d(a2, params["w2"], params["b2"], 1, (0, 0))
    return xf + y    # dropout = identity (eval)


if __name__ == "__main__":
    # Module defaults: filters=128, kernel_size=3, dilation=1 -> ConvBlock1 maps
    # C=128 -> 192, ConvBlock2 maps 192 -> 128.  Small B and L keep the test tiny
    # while staying lane-dense (L=128) and MXU-friendly (contraction = channels).
    B, C, L = 2, 128, 128
    C_MID = int(C * 1.5)       # 192
    K = 3
    DILATION = 1

    key = jax.random.PRNGKey(0)
    ks = jax.random.split(key, 13)
    x = jax.random.normal(ks[0], (B, C, L), dtype=jnp.float32)

    params = {
        "bn1": (1.0 + 0.1 * jax.random.normal(ks[1], (C,)),                  # gamma
                0.1 * jax.random.normal(ks[2], (C,)),                        # beta
                0.1 * jax.random.normal(ks[3], (C,)),                        # running_mean
                jax.random.uniform(ks[4], (C,), minval=0.5, maxval=1.5)),    # running_var
        "w1": jax.random.normal(ks[5], (C_MID, C, K)) * (1.0 / (C * K) ** 0.5),
        "b1": 0.1 * jax.random.normal(ks[6], (C_MID,)),
        "bn2": (1.0 + 0.1 * jax.random.normal(ks[7], (C_MID,)),
                0.1 * jax.random.normal(ks[8], (C_MID,)),
                0.1 * jax.random.normal(ks[9], (C_MID,)),
                jax.random.uniform(ks[10], (C_MID,), minval=0.5, maxval=1.5)),
        "w2": jax.random.normal(ks[11], (C, C_MID, 1)) * (1.0 / C_MID ** 0.5),
        "b2": 0.1 * jax.random.normal(ks[12], (C,)),
    }

    out = res_conv_block(x, params, kernel_size=K, dilation=DILATION)
    out = jax.block_until_ready(out)

    ref = reference(x, params, kernel_size=K, dilation=DILATION)
    assert out.shape == (B, C, L), out.shape
    max_err = float(jnp.max(jnp.abs(out - ref)))
    # Both sides use bf16 MXU operands with f32 accumulation -> tight agreement;
    # tolerance leaves headroom for EUP-vs-XLA transcendental ulp differences.
    assert jnp.allclose(out, ref, atol=5e-3, rtol=5e-3), ("mismatch", max_err)
    print("KERNEL_OK")
</pallas_src>

<mosaic_0001>
module attributes {stable_mosaic.version = 11 : i64} {
  func.func @kernel(%arg0: i32, %arg1: memref<1x128x128xf32, #tpu.memory_space<vmem>>, %arg2: memref<128x1xf32, #tpu.memory_space<vmem>>, %arg3: memref<128x1xf32, #tpu.memory_space<vmem>>, %arg4: memref<3x192x128xbf16, #tpu.memory_space<vmem>>, %arg5: memref<192x1xf32, #tpu.memory_space<vmem>>, %arg6: memref<192x1xf32, #tpu.memory_space<vmem>>, %arg7: memref<192x1xf32, #tpu.memory_space<vmem>>, %arg8: memref<128x192xbf16, #tpu.memory_space<vmem>>, %arg9: memref<128x1xf32, #tpu.memory_space<vmem>>, %arg10: memref<1x128x128xf32, #tpu.memory_space<vmem>>) attributes {dimension_semantics = [#tpu.dimension_semantics<parallel>], iteration_bounds = array<i64: 2>, scalar_prefetch = 0 : i64, scratch_operands = 0 : i64, tpu.core_type = #tpu.core_type<tc>, window_params = [{transform_indices = @transform_0, window_bounds = array<i64: 1, 128, 128>}, {pipeline_mode = #tpu.pipeline_mode<synchronous>, transform_indices = @transform_1, window_bounds = array<i64: 128, 1>}, {pipeline_mode = #tpu.pipeline_mode<synchronous>, transform_indices = @transform_2, window_bounds = array<i64: 128, 1>}, {pipeline_mode = #tpu.pipeline_mode<synchronous>, transform_indices = @transform_3, window_bounds = array<i64: 3, 192, 128>}, {pipeline_mode = #tpu.pipeline_mode<synchronous>, transform_indices = @transform_4, window_bounds = array<i64: 192, 1>}, {pipeline_mode = #tpu.pipeline_mode<synchronous>, transform_indices = @transform_5, window_bounds = array<i64: 192, 1>}, {pipeline_mode = #tpu.pipeline_mode<synchronous>, transform_indices = @transform_6, window_bounds = array<i64: 192, 1>}, {pipeline_mode = #tpu.pipeline_mode<synchronous>, transform_indices = @transform_7, window_bounds = array<i64: 128, 192>}, {pipeline_mode = #tpu.pipeline_mode<synchronous>, transform_indices = @transform_8, window_bounds = array<i64: 128, 1>}, {transform_indices = @transform_9, window_bounds = array<i64: 1, 128, 128>}]} {
    %c0 = arith.constant 0 : index
    %c0_0 = arith.constant 0 : index
    %c0_1 = arith.constant 0 : index
    %0 = vector.load %arg1[%c0, %c0_0, %c0_1] : memref<1x128x128xf32, #tpu.memory_space<vmem>>, vector<1x128x128xf32>
    %1 = vector.shape_cast %0 : vector<1x128x128xf32> to vector<128x128xf32>
    %c0_2 = arith.constant 0 : index
    %c0_3 = arith.constant 0 : index
    %2 = vector.load %arg2[%c0_2, %c0_3] : memref<128x1xf32, #tpu.memory_space<vmem>>, vector<128x1xf32>
    %3 = vector.broadcast %2 : vector<128x1xf32> to vector<128x128xf32>
    %4 = arith.mulf %1, %3 : vector<128x128xf32>
    %c0_4 = arith.constant 0 : index
    %c0_5 = arith.constant 0 : index
    %5 = vector.load %arg3[%c0_4, %c0_5] : memref<128x1xf32, #tpu.memory_space<vmem>>, vector<128x1xf32>
    %6 = vector.broadcast %5 : vector<128x1xf32> to vector<128x128xf32>
    %7 = arith.addf %4, %6 : vector<128x128xf32>
    %cst = arith.constant 0.000000e+00 : f32
    %8 = vector.broadcast %cst : f32 to vector<128x128xf32>
    %9 = arith.maximumf %7, %8 : vector<128x128xf32>
    %10 = math.absf %7 : vector<128x128xf32>
    %cst_6 = arith.constant 0.000000e+00 : f32
    %11 = vector.broadcast %cst_6 : f32 to vector<128x128xf32>
    %12 = arith.subf %11, %10 : vector<128x128xf32>
    %13 = math.exp %12 : vector<128x128xf32>
    %cst_7 = arith.constant 1.000000e+00 : f32
    %14 = vector.broadcast %cst_7 : f32 to vector<128x128xf32>
    %15 = arith.addf %14, %13 : vector<128x128xf32>
    %16 = math.log %15 : vector<128x128xf32>
    %17 = arith.addf %9, %16 : vector<128x128xf32>
    %18 = math.tanh %17 : vector<128x128xf32>
    %19 = arith.mulf %7, %18 : vector<128x128xf32>
    %20 = tpu.iota {dimensions = array<i32: 1>} : vector<128x128xi32>
    %cst_8 = arith.constant 0.000000e+00 : f32
    %21 = vector.broadcast %cst_8 : f32 to vector<192x128xf32>
    %c1_i32 = arith.constant 1 : i32
    %22 = tpu.dynamic_rotate %19 by %c1_i32 dim 1 : vector<128x128xf32>, i32 -> vector<128x128xf32>
    %c-1_i32 = arith.constant -1 : i32
    %23 = vector.broadcast %c-1_i32 : i32 to vector<128x128xi32>
    %24 = arith.addi %20, %23 : vector<128x128xi32>
    %c0_i32 = arith.constant 0 : i32
    %25 = vector.broadcast %c0_i32 : i32 to vector<128x128xi32>
    %26 = arith.cmpi sge, %24, %25 : vector<128x128xi32>
    %c-1_i32_9 = arith.constant -1 : i32
    %27 = vector.broadcast %c-1_i32_9 : i32 to vector<128x128xi32>
    %28 = arith.addi %20, %27 : vector<128x128xi32>
    %c128_i32 = arith.constant 128 : i32
    %29 = vector.broadcast %c128_i32 : i32 to vector<128x128xi32>
    %30 = arith.cmpi slt, %28, %29 : vector<128x128xi32>
    %31 = arith.andi %26, %30 : vector<128x128xi1>
    %cst_10 = arith.constant 0.000000e+00 : f32
    %32 = vector.broadcast %cst_10 : f32 to vector<128x128xf32>
    %33 = arith.select %31, %22, %32 : vector<128x128xi1>, vector<128x128xf32>
    %c0_11 = arith.constant 0 : index
    %c0_12 = arith.constant 0 : index
    %c0_13 = arith.constant 0 : index
    %34 = vector.load %arg4[%c0_11, %c0_12, %c0_13] : memref<3x192x128xbf16, #tpu.memory_space<vmem>>, vector<1x192x128xbf16>
    %35 = vector.shape_cast %34 : vector<1x192x128xbf16> to vector<192x128xbf16>
    %36 = arith.truncf %33 : vector<128x128xf32> to vector<128x128xbf16>
    %cst_14 = arith.constant dense<0.000000e+00> : vector<192x128xf32>
    %37 = tpu.matmul %35, %36, %cst_14 {dimension_numbers = #tpu.dot_dimension_numbers<[1], [0], [0], [1], [0, 0, 1, 1], [], []>} : vector<192x128xbf16>, vector<128x128xbf16>, vector<192x128xf32> -> vector<192x128xf32>
    %38 = arith.addf %21, %37 : vector<192x128xf32>
    %c1 = arith.constant 1 : index
    %c0_15 = arith.constant 0 : index
    %c0_16 = arith.constant 0 : index
    %39 = vector.load %arg4[%c1, %c0_15, %c0_16] : memref<3x192x128xbf16, #tpu.memory_space<vmem>>, vector<1x192x128xbf16>
    %40 = vector.shape_cast %39 : vector<1x192x128xbf16> to vector<192x128xbf16>
    %41 = arith.truncf %19 : vector<128x128xf32> to vector<128x128xbf16>
    %cst_17 = arith.constant dense<0.000000e+00> : vector<192x128xf32>
    %42 = tpu.matmul %40, %41, %cst_17 {dimension_numbers = #tpu.dot_dimension_numbers<[1], [0], [0], [1], [0, 0, 1, 1], [], []>} : vector<192x128xbf16>, vector<128x128xbf16>, vector<192x128xf32> -> vector<192x128xf32>
    %43 = arith.addf %38, %42 : vector<192x128xf32>
    %c127_i32 = arith.constant 127 : i32
    %44 = tpu.dynamic_rotate %19 by %c127_i32 dim 1 : vector<128x128xf32>, i32 -> vector<128x128xf32>
    %c1_i32_18 = arith.constant 1 : i32
    %45 = vector.broadcast %c1_i32_18 : i32 to vector<128x128xi32>
    %46 = arith.addi %20, %45 : vector<128x128xi32>
    %c0_i32_19 = arith.constant 0 : i32
    %47 = vector.broadcast %c0_i32_19 : i32 to vector<128x128xi32>
    %48 = arith.cmpi sge, %46, %47 : vector<128x128xi32>
    %c1_i32_20 = arith.constant 1 : i32
    %49 = vector.broadcast %c1_i32_20 : i32 to vector<128x128xi32>
    %50 = arith.addi %20, %49 : vector<128x128xi32>
    %c128_i32_21 = arith.constant 128 : i32
    %51 = vector.broadcast %c128_i32_21 : i32 to vector<128x128xi32>
    %52 = arith.cmpi slt, %50, %51 : vector<128x128xi32>
    %53 = arith.andi %48, %52 : vector<128x128xi1>
    %cst_22 = arith.constant 0.000000e+00 : f32
    %54 = vector.broadcast %cst_22 : f32 to vector<128x128xf32>
    %55 = arith.select %53, %44, %54 : vector<128x128xi1>, vector<128x128xf32>
    %c2 = arith.constant 2 : index
    %c0_23 = arith.constant 0 : index
    %c0_24 = arith.constant 0 : index
    %56 = vector.load %arg4[%c2, %c0_23, %c0_24] : memref<3x192x128xbf16, #tpu.memory_space<vmem>>, vector<1x192x128xbf16>
    %57 = vector.shape_cast %56 : vector<1x192x128xbf16> to vector<192x128xbf16>
    %58 = arith.truncf %55 : vector<128x128xf32> to vector<128x128xbf16>
    %cst_25 = arith.constant dense<0.000000e+00> : vector<192x128xf32>
    %59 = tpu.matmul %57, %58, %cst_25 {dimension_numbers = #tpu.dot_dimension_numbers<[1], [0], [0], [1], [0, 0, 1, 1], [], []>} : vector<192x128xbf16>, vector<128x128xbf16>, vector<192x128xf32> -> vector<192x128xf32>
    %60 = arith.addf %43, %59 : vector<192x128xf32>
    %c0_26 = arith.constant 0 : index
    %c0_27 = arith.constant 0 : index
    %61 = vector.load %arg5[%c0_26, %c0_27] : memref<192x1xf32, #tpu.memory_space<vmem>>, vector<192x1xf32>
    %62 = vector.broadcast %61 : vector<192x1xf32> to vector<192x128xf32>
    %63 = arith.addf %60, %62 : vector<192x128xf32>
    %c0_28 = arith.constant 0 : index
    %c0_29 = arith.constant 0 : index
    %64 = vector.load %arg6[%c0_28, %c0_29] : memref<192x1xf32, #tpu.memory_space<vmem>>, vector<192x1xf32>
    %65 = vector.broadcast %64 : vector<192x1xf32> to vector<192x128xf32>
    %66 = arith.mulf %63, %65 : vector<192x128xf32>
    %c0_30 = arith.constant 0 : index
    %c0_31 = arith.constant 0 : index
    %67 = vector.load %arg7[%c0_30, %c0_31] : memref<192x1xf32, #tpu.memory_space<vmem>>, vector<192x1xf32>
    %68 = vector.broadcast %67 : vector<192x1xf32> to vector<192x128xf32>
    %69 = arith.addf %66, %68 : vector<192x128xf32>
    %cst_32 = arith.constant 0.000000e+00 : f32
    %70 = vector.broadcast %cst_32 : f32 to vector<192x128xf32>
    %71 = arith.maximumf %69, %70 : vector<192x128xf32>
    %72 = math.absf %69 : vector<192x128xf32>
    %cst_33 = arith.constant 0.000000e+00 : f32
    %73 = vector.broadcast %cst_33 : f32 to vector<192x128xf32>
    %74 = arith.subf %73, %72 : vector<192x128xf32>
    %75 = math.exp %74 : vector<192x128xf32>
    %cst_34 = arith.constant 1.000000e+00 : f32
    %76 = vector.broadcast %cst_34 : f32 to vector<192x128xf32>
    %77 = arith.addf %76, %75 : vector<192x128xf32>
    %78 = math.log %77 : vector<192x128xf32>
    %79 = arith.addf %71, %78 : vector<192x128xf32>
    %80 = math.tanh %79 : vector<192x128xf32>
    %81 = arith.mulf %69, %80 : vector<192x128xf32>
    %c0_35 = arith.constant 0 : index
    %c0_36 = arith.constant 0 : index
    %82 = vector.load %arg8[%c0_35, %c0_36] : memref<128x192xbf16, #tpu.memory_space<vmem>>, vector<128x192xbf16>
    %83 = arith.truncf %81 : vector<192x128xf32> to vector<192x128xbf16>
    %cst_37 = arith.constant dense<0.000000e+00> : vector<128x128xf32>
    %84 = tpu.matmul %82, %83, %cst_37 {dimension_numbers = #tpu.dot_dimension_numbers<[1], [0], [0], [1], [0, 0, 1, 1], [], []>} : vector<128x192xbf16>, vector<192x128xbf16>, vector<128x128xf32> -> vector<128x128xf32>
    %c0_38 = arith.constant 0 : index
    %c0_39 = arith.constant 0 : index
    %85 = vector.load %arg9[%c0_38, %c0_39] : memref<128x1xf32, #tpu.memory_space<vmem>>, vector<128x1xf32>
    %86 = vector.broadcast %85 : vector<128x1xf32> to vector<128x128xf32>
    %87 = arith.addf %84, %86 : vector<128x128xf32>
    %88 = arith.addf %1, %87 : vector<128x128xf32>
    %c0_40 = arith.constant 0 : index
    %c0_41 = arith.constant 0 : index
    %c0_42 = arith.constant 0 : index
    %89 = vector.load %arg10[%c0_40, %c0_41, %c0_42] : memref<1x128x128xf32, #tpu.memory_space<vmem>>, vector<1x128x128xf32>
    %90 = vector.shape_cast %89 : vector<1x128x128xf32> to vector<128x128xf32>
    %91 = vector.shape_cast %88 : vector<128x128xf32> to vector<1x128x128xf32>
    tpu.vector_store %arg10[%c0_40, %c0_41, %c0_42], %91 {strides = array<i32>} : memref<1x128x128xf32, #tpu.memory_space<vmem>>, vector<1x128x128xf32>,
    return
  }
  func.func @transform_0(%arg0: i32) -> (i32, i32, i32) {
    %c0_i32 = arith.constant 0 : i32
    %c0_i32_0 = arith.constant 0 : i32
    %c0_i32_1 = arith.constant 0 : i32
    return %arg0, %c0_i32, %c0_i32_0 : i32, i32, i32
  }
  func.func @transform_1(%arg0: i32) -> (i32, i32) {
    %c0_i32 = arith.constant 0 : i32
    %c0_i32_0 = arith.constant 0 : i32
    %c0_i32_1 = arith.constant 0 : i32
    return %c0_i32, %c0_i32_0 : i32, i32
  }
  func.func @transform_2(%arg0: i32) -> (i32, i32) {
    %c0_i32 = arith.constant 0 : i32
    %c0_i32_0 = arith.constant 0 : i32
    %c0_i32_1 = arith.constant 0 : i32
    return %c0_i32, %c0_i32_0 : i32, i32
  }
  func.func @transform_3(%arg0: i32) -> (i32, i32, i32) {
    %c0_i32 = arith.constant 0 : i32
    %c0_i32_0 = arith.constant 0 : i32
    %c0_i32_1 = arith.constant 0 : i32
    %c0_i32_2 = arith.constant 0 : i32
    return %c0_i32, %c0_i32_0, %c0_i32_1 : i32, i32, i32
  }
  func.func @transform_4(%arg0: i32) -> (i32, i32) {
    %c0_i32 = arith.constant 0 : i32
    %c0_i32_0 = arith.constant 0 : i32
    %c0_i32_1 = arith.constant 0 : i32
    return %c0_i32, %c0_i32_0 : i32, i32
  }
  func.func @transform_5(%arg0: i32) -> (i32, i32) {
    %c0_i32 = arith.constant 0 : i32
    %c0_i32_0 = arith.constant 0 : i32
    %c0_i32_1 = arith.constant 0 : i32
    return %c0_i32, %c0_i32_0 : i32, i32
  }
  func.func @transform_6(%arg0: i32) -> (i32, i32) {
    %c0_i32 = arith.constant 0 : i32
    %c0_i32_0 = arith.constant 0 : i32
    %c0_i32_1 = arith.constant 0 : i32
    return %c0_i32, %c0_i32_0 : i32, i32
  }
  func.func @transform_7(%arg0: i32) -> (i32, i32) {
    %c0_i32 = arith.constant 0 : i32
    %c0_i32_0 = arith.constant 0 : i32
    %c0_i32_1 = arith.constant 0 : i32
    return %c0_i32, %c0_i32_0 : i32, i32
  }
  func.func @transform_8(%arg0: i32) -> (i32, i32) {
    %c0_i32 = arith.constant 0 : i32
    %c0_i32_0 = arith.constant 0 : i32
    %c0_i32_1 = arith.constant 0 : i32
    return %c0_i32, %c0_i32_0 : i32, i32
  }
  func.func @transform_9(%arg0: i32) -> (i32, i32, i32) {
    %c0_i32 = arith.constant 0 : i32
    %c0_i32_0 = arith.constant 0 : i32
    %c0_i32_1 = arith.constant 0 : i32
    return %arg0, %c0_i32, %c0_i32_0 : i32, i32, i32
  }
}

</mosaic_0001>

<bundles_post_ra>
// kernel: tpu_custom_call.1
= control target key start
LH: loop header
LB: loop body
LE: loop exit
PB: predicated region body
PF: predicated region fallthrough
CT: control target
= control target key end

     0   :  { %s4967_s0 = inlined_call_operand.vmem [shape: f32[2,128,128], index: 0, kind: input, shape index: {}]   ;;  %s4968_s1 = inlined_call_operand.vmem [shape: f32[128,1], index: 1, kind: input, shape index: {}]   ;;  %s4969_s2 = inlined_call_operand.vmem [shape: f32[128,1], index: 2, kind: input, shape index: {}]   ;;  %s4970_s3 = inlined_call_operand.vmem [shape: bf16[3,192,128], index: 3, kind: input, shape index: {}]   ;;  %s4971_s4 = inlined_call_operand.vmem [shape: f32[192,1], index: 4, kind: input, shape index: {}]   ;;  %s4972_s5 = inlined_call_operand.vmem [shape: f32[192,1], index: 5, kind: input, shape index: {}]   ;;  %s4973_s6 = inlined_call_operand.vmem [shape: f32[192,1], index: 6, kind: input, shape index: {}]   ;;  %s4974_s7 = inlined_call_operand.vmem [shape: bf16[128,192], index: 7, kind: input, shape index: {}]   ;;  %s4975_s8 = inlined_call_operand.vmem [shape: f32[128,1], index: 8, kind: input, shape index: {}]   ;;  %s4976_s9 = inlined_call_operand.hbm [shape: f32[2,128,128], index: 9, kind: output, shape index: {}]  }
   0x1   :  { %4981 = sst [smem:[#allocation40_spill]] %s4967_s0 }
   0x2   :  { %14 = vsyncpa [#allocation3], 0 }
   0x3   :  { %16 = vsyncpa [#allocation3 + $0x1], 0  ;;  %s3707_s30 = smov 0   ;;  %s3709_s10 = smov 0  }
   0x4   :  { %s3711_s11 = smov 0   ;;  %s3713_s12 = smov 0  }
   0x5 LB: > { %s3728_s13 = sadd.s32 4294967295, %s3649_s12   ;;  %s2773_s14 = sadd.s32 4294967294, %s3649_s12   ;;  %s3649_s12 = sphi %s3713_s12, %s5063_s12   ;;  %s3645_s11 = sphi %s3711_s11, %s5062_s11   ;;  %s3641_s10 = sphi %s3709_s10, %s5061_s10   ;;  %s3637_s30 = sphi %s3707_s30, %s5060_s30  }
   0x6   : > { %s3732_s15 = sadd.s32 1, %s3649_s12   ;;  %s223_s16 = sadd.s32 1, %s3645_s11 }
   0x7   : > { %s220_s17 = ssub.s32 %s3649_s12, %s3732_s15  ;;  %p233_p0 = scmp.ne.s32.totalorder %s3645_s11, %s3641_s10 }
   0x8   : > { %p221_p1 = scmp.eq.s32.totalorder %s220_s17, 0  ;;  %p234_p2 = scmp.eq.s32.totalorder %s3728_s13, 1 }
   0x9   : > { %p239_p3 = scmp.ne.s32.totalorder %s3641_s10, %s3637_s30  ;;  %p240_p4 = scmp.eq.s32.totalorder %s2773_s14, 1 }
   0xa   : > { %s3743_s18 = scalar_select %p221_p1, %s3645_s11, %s223_s16  }
   0xb   : > { %p3745_p5 = por %p234_p2, %p233_p0  ;;  %p3749_p6 = por %p240_p4, %p239_p3 }
   0xc   : > { %p2776_p7 = scmp.ge.s32.totalorder %s3649_s12, 1  ;;  %p290_p8 = scmp.lt.s32.totalorder %s3649_s12, 3 }
   0xe   : > { %p291_p9 = pnand %p2776_p7, %p290_p8 }
  0x10   : > { %294 = sbr.rel (%p291_p9) target bundleno = 1004 (0x3ec), region = 56 }
  0x15   : > { %v474_v0 = vld [vmem:[%s4969_s2 + $0x70] sm:$0xff]  ;;  %v4977_v2 = vmov 0   ;;  %v475_v3 = vld [vmem:[%s4969_s2 + $0x78] sm:$0xff]  ;;  %v361_v5 = vld [vmem:[%s4968_s1 + $0x68] sm:$0xff]  ;;  %p326_p10 = scmp.lt.s32.totalorder %s3728_s13, 1  ;;  %s4984_s0 = sld [smem:[#allocation40_spill]] }
  0x16   : > { %v362_v1 = vld [vmem:[%s4968_s1 + $0x70] sm:$0xff]  ;;  %3192 = vset.pattern.permute.xlu1 %v4977_v2  ;;  %3191 = vset.pattern.permute.xlu0 %v4977_v2  ;;  %v363_v4 = vld [vmem:[%s4968_s1 + $0x78] sm:$0xff]  ;;  %v360_v6 = vld [vmem:[%s4968_s1 + $0x60] sm:$0xff]  ;;  %s3652_s17 = smov 127   ;;  %s3653_s21 = smov 1   ;;  %vm2543_vm4 = vcmask 523264  }
  0x17   : > { %548 = vperm.xlu1 %3192, %v474_v0   ;;  %436 = vperm.xlu0 %3191, %v362_v1   ;;  %v473_v7 = vld [vmem:[%s4969_s2 + $0x68] sm:$0xff]  ;;  %v472_v8 = vld [vmem:[%s4969_s2 + $0x60] sm:$0xff]  ;;  %v359_v9 = vld [vmem:[%s4968_s1 + $0x58] sm:$0xff]  ;;  %s327_s25 = scalar_select %p326_p10, %s3728_s13, 1 }
  0x18   : > { %v358_v10 = vld [vmem:[%s4968_s1 + $0x50] sm:$0xff]  ;;  %v471_v11 = vld [vmem:[%s4969_s2 + $0x58] sm:$0xff]  ;;  %v357_v13 = vld [vmem:[%s4968_s1 + $0x48] sm:$0xff]  ;;  %s2942_s14 = sshll.u32 %s3728_s13, 11  ;;  %s3654_s23 = smov [#allocation2]  }
  0x19   : > { %v470_v12 = vld [vmem:[%s4969_s2 + $0x50] sm:$0xff]  ;;  %v356_v14 = vld [vmem:[%s4968_s1 + $0x40] sm:$0xff]  ;;  %v469_v15 = vld [vmem:[%s4969_s2 + $0x48] sm:$0xff]  ;;  %s2941_s26 = sshll.u32 %s327_s25, 7  ;;  %s3593_s24 = sshll.u32 %s3654_s23, 4  ;;  %s3594_s24 = int_to_ptr.vmem [resolvable:$false] %s3593_s24 }
  0x1a   : > { %v468_v16 = vld [vmem:[%s4969_s2 + $0x40] sm:$0xff]  ;;  %v355_v17 = vld [vmem:[%s4968_s1 + $0x38] sm:$0xff]  ;;  %v354_v18 = vld [vmem:[%s4968_s1 + $0x30] sm:$0xff]  ;;  %s3595_s25 = scalar_lea.vmem %s3594_s24, 4096 }
  0x1b   : > { %553 = vperm.xlu1 %3192, %v475_v3   ;;  %441 = vperm.xlu0 %3191, %v363_v4   ;;  %v467_v19 = vld [vmem:[%s4969_s2 + $0x38] sm:$0xff]  ;;  %v466_v20 = vld [vmem:[%s4969_s2 + $0x30] sm:$0xff]  ;;  %v353_v21 = vld [vmem:[%s4968_s1 + $0x28] sm:$0xff]  ;;  %s3858_s29 = scalar_lea.vmem %s4984_s0, %s2941_s26  ;;  %s323_s26 = sand.u32 1, %s3641_s10  }
  0x1c   : > { %v352_v22 = vld [vmem:[%s4968_s1 + $0x20] sm:$0xff]  ;;  %v465_v23 = vld [vmem:[%s4969_s2 + $0x28] sm:$0xff]  ;;  %v351_v25 = vld [vmem:[%s4968_s1 + $0x18] sm:$0xff]  ;;  %s2777_s27 = sshll.u32 %s323_s26, 7  ;;  %s4927_s13 = scalar_lea.sflag [#allocation3], %s323_s26 }
  0x1d   : > { %v464_v24 = vld [vmem:[%s4969_s2 + $0x20] sm:$0xff]  ;;  %v350_v26 = vld [vmem:[%s4968_s1 + $0x10] sm:$0xff]  ;;  %v463_v27 = vld [vmem:[%s4969_s2 + $0x18] sm:$0xff]  ;;  %s4884_s28 = scalar_lea.vmem [#allocation2], %s2777_s27 }
  0x1e   : > { %v462_v28 = vld [vmem:[%s4969_s2 + $0x10] sm:$0xff]  ;;  %v349_v29 = vld [vmem:[%s4968_s1 + $0x8] sm:$0xff]  ;;  %v348_v30 = vld [vmem:[%s4968_s1] sm:$0xff]  ;;  %s2711_s16 = sshll.u32 %s4884_s28, 4  ;;  %s4921_s16 = int_to_ptr.vmem [resolvable:$true] %s2711_s16 }
  0x1f   : > { %431 = vperm.xlu1 %3192, %v361_v5   ;;  %426 = vperm.xlu0 %3191, %v360_v6   ;;  %v461_v31 = vld [vmem:[%s4969_s2 + $0x8] sm:$0xff]  ;;  %v460_v32 = vld [vmem:[%s4969_s2] sm:$0xff]  ;;  %v346_v33 = vld [vmem:[%s3858_s29 + $0x70] sm:$0xff]  ;;  %p3596_p0 = scmp.lt.s32.totalorder %s4921_s16, %s3594_s24 }
  0x20   : > { %v347_v37 = vld [vmem:[%s3858_s29 + $0x78] sm:$0xff]  ;;  %v345_v46 = vld [vmem:[%s3858_s29 + $0x68] sm:$0xff]  ;;  %v344_v48 = vld [vmem:[%s3858_s29 + $0x60] sm:$0xff] }
  0x21   : > { %v343_v62 = vld [vmem:[%s3858_s29 + $0x58] sm:$0xff]  ;;  %v342_v0 = vld [vmem:[%s3858_s29 + $0x50] sm:$0xff] }
  0x23   : > { %543 = vperm.xlu1 %3192, %v473_v7   ;;  %538 = vperm.xlu0 %3191, %v472_v8  }
  0x27   : > { %421 = vperm.xlu1 %3192, %v359_v9   ;;  %416 = vperm.xlu0 %3191, %v358_v10  }
  0x2b   : > { %533 = vperm.xlu1 %3192, %v471_v11   ;;  %528 = vperm.xlu0 %3191, %v470_v12  }
  0x2f   : > { %411 = vperm.xlu1 %3192, %v357_v13   ;;  %406 = vperm.xlu0 %3191, %v356_v14   ;;  %v341_v14 = vld [vmem:[%s3858_s29 + $0x48] sm:$0xff] }
  0x33   : > { %523 = vperm.xlu1 %3192, %v469_v15   ;;  %518 = vperm.xlu0 %3191, %v468_v16  }
  0x37   : > { %401 = vperm.xlu1 %3192, %v355_v17   ;;  %396 = vperm.xlu0 %3191, %v354_v18   ;;  %v340_v18 = vld [vmem:[%s3858_s29 + $0x40] sm:$0xff] }
  0x3b   : > { %513 = vperm.xlu1 %3192, %v467_v19   ;;  %508 = vperm.xlu0 %3191, %v466_v20  }
  0x3f   : > { %391 = vperm.xlu1 %3192, %v353_v21   ;;  %386 = vperm.xlu0 %3191, %v352_v22  }
  0x43   : > { %503 = vperm.xlu1 %3192, %v465_v23   ;;  %498 = vperm.xlu0 %3191, %v464_v24  }
  0x47   : > { %381 = vperm.xlu1 %3192, %v351_v25   ;;  %376 = vperm.xlu0 %3191, %v350_v26  }
  0x4b   : > { %493 = vperm.xlu1 %3192, %v463_v27   ;;  %488 = vperm.xlu0 %3191, %v462_v28  }
  0x4f   : > { %371 = vperm.xlu1 %3192, %v349_v29   ;;  %366 = vperm.xlu0 %3191, %v348_v30  }
  0x53   : > { %483 = vperm.xlu1 %3192, %v461_v31   ;;  %478 = vperm.xlu0 %3191, %v460_v32  }
  0x92   : > { %v549_v34 = vpop.permute.xlu1 %548  ;;  %v437_v35 = vpop.permute.xlu0 %436 }
  0x93   : > { %v458_v36 = vmul.f32 %v437_v35, %v346_v33  ;;  %v339_v35 = vld [vmem:[%s3858_s29 + $0x38] sm:$0xff] }
  0x95   : > { %v3862_v38 = vadd.f32 %v549_v34, %v458_v36 }
  0x96   : > { %v554_v39 = vpop.permute.xlu1 %553  ;;  %v442_v40 = vpop.permute.xlu0 %441 }
  0x97   : > { %v602_v41 = vand.u32 2147483647, %v3862_v38  ;;  %v459_v42 = vmul.f32 %v442_v40, %v347_v37  ;;  %v338_v37 = vld [vmem:[%s3858_s29 + $0x30] sm:$0xff] }
  0x99   : > { %v618_v43 = vsub.f32 0.0, %v602_v41  ;;  %v3865_v44 = vadd.f32 %v554_v39, %v459_v42 }
  0x9a   : > { %v432_v45 = vpop.permute.xlu1 %431  ;;  %v427_v47 = vpop.permute.xlu0 %426 }
  0x9b   : > { %v648_v49 = vmul.f32 1.442695, %v618_v43  ;;  %v603_v50 = vand.u32 2147483647, %v3865_v44  ;;  %v457_v52 = vmul.f32 %v432_v45, %v345_v46  ;;  %v456_v53 = vmul.f32 %v427_v47, %v344_v48 }
  0x9d   : > { %3333 = vpow2.f32 %v648_v49  ;;  %v619_v51 = vsub.f32 0.0, %v603_v50 }
  0x9e   : > { %v544_v54 = vpop.permute.xlu1 %543  ;;  %v539_v55 = vpop.permute.xlu0 %538 }
  0x9f   : > { %v650_v56 = vmul.f32 1.442695, %v619_v51  ;;  %v3870_v57 = vadd.f32 %v544_v54, %v457_v52  ;;  %v3872_v58 = vadd.f32 %v539_v55, %v456_v53 }
  0xa1   : > { %3335 = vpow2.f32 %v650_v56  ;;  %v601_v59 = vand.u32 2147483647, %v3870_v57  ;;  %v600_v60 = vand.u32 2147483647, %v3872_v58 }
  0xa2   : > { %v422_v61 = vpop.permute.xlu1 %421  ;;  %v417_v63 = vpop.permute.xlu0 %416 }
  0xa3   : > { %v617_v1 = vsub.f32 0.0, %v601_v59  ;;  %v616_v3 = vsub.f32 0.0, %v600_v60  ;;  %v455_v5 = vmul.f32 %v422_v61, %v343_v62  ;;  %v454_v6 = vmul.f32 %v417_v63, %v342_v0  ;;  %v337_v60 = vld [vmem:[%s3858_s29 + $0x28] sm:$0xff]  ;;  %v336_v62 = vld [vmem:[%s3858_s29 + $0x20] sm:$0xff] }
  0xa4   : > { %v586_v63 = vmax.f32 %v3862_v38, 0.0 }
  0xa5   : > { %v646_v4 = vmul.f32 1.442695, %v617_v1  ;;  %v644_v7 = vmul.f32 1.442695, %v616_v3 }
  0xa6   : > { %v534_v8 = vpop.permute.xlu1 %533  ;;  %v529_v9 = vpop.permute.xlu0 %528 }
  0xa7   : > { %3337 = vpow2.f32 %v646_v4  ;;  %v3878_v10 = vadd.f32 %v534_v8, %v455_v5  ;;  %v3880_v11 = vadd.f32 %v529_v9, %v454_v6 }
  0xa8   : > { %3339 = vpow2.f32 %v644_v7 }
  0xa9   : > { %v599_v12 = vand.u32 2147483647, %v3878_v10  ;;  %v598_v13 = vand.u32 2147483647, %v3880_v11 }
  0xaa   : > { %v3334_v15 = vpop.eup %3333  ;;  %v412_v16 = vpop.permute.xlu1 %411 }
  0xab   : > { %v407_v17 = vpop.permute.xlu0 %406  ;;  %v666_v19 = vadd.f32 1.0, %v3334_v15  ;;  %v615_v20 = vsub.f32 0.0, %v599_v12  ;;  %v614_v21 = vsub.f32 0.0, %v598_v13  ;;  %v453_v22 = vmul.f32 %v412_v16, %v341_v14 }
  0xac   : > { %v452_v25 = vmul.f32 %v407_v17, %v340_v18  ;;  %v587_v13 = vmax.f32 %v3865_v44, 0.0 }
  0xad   : > { %3341 = vlog2.f32 %v666_v19  ;;  %v642_v23 = vmul.f32 1.442695, %v615_v20  ;;  %v640_v24 = vmul.f32 1.442695, %v614_v21 }
  0xae   : > { %v3336_v26 = vpop.eup %3335  ;;  %v524_v27 = vpop.permute.xlu1 %523 }
  0xaf   : > { %v519_v28 = vpop.permute.xlu0 %518  ;;  %v667_v29 = vadd.f32 1.0, %v3336_v26  ;;  %3343 = vpow2.f32 %v642_v23  ;;  %v3886_v30 = vadd.f32 %v524_v27, %v453_v22  ;;  %v335_v26 = vld [vmem:[%s3858_s29 + $0x18] sm:$0xff] }
  0xb0   : > { %v3888_v31 = vadd.f32 %v519_v28, %v452_v25  ;;  %3345 = vpow2.f32 %v640_v24 }
  0xb1   : > { %3347 = vlog2.f32 %v667_v29  ;;  %v597_v32 = vand.u32 2147483647, %v3886_v30  ;;  %v334_v29 = vld [vmem:[%s3858_s29 + $0x10] sm:$0xff] }
  0xb2   : > { %v596_v33 = vand.u32 2147483647, %v3888_v31  ;;  %v402_v34 = vpop.permute.xlu1 %401 }
  0xb3   : > { %v397_v36 = vpop.permute.xlu0 %396  ;;  %v613_v39 = vsub.f32 0.0, %v597_v32  ;;  %v451_v46 = vmul.f32 %v402_v34, %v339_v35  ;;  %v585_v35 = vmax.f32 %v3870_v57, 0.0 }
  0xb4   : > { %v3338_v40 = vpop.eup %3337  ;;  %v612_v41 = vsub.f32 0.0, %v596_v33  ;;  %v450_v47 = vmul.f32 %v397_v36, %v338_v37 }
  0xb5   : > { %v3340_v42 = vpop.eup %3339  ;;  %v665_v43 = vadd.f32 1.0, %v3338_v40  ;;  %v638_v45 = vmul.f32 1.442695, %v613_v39 }
  0xb6   : > { %v664_v48 = vadd.f32 1.0, %v3340_v42  ;;  %v636_v49 = vmul.f32 1.442695, %v612_v41  ;;  %v514_v50 = vpop.permute.xlu1 %513  ;;  %v584_v41 = vmax.f32 %v3872_v58, 0.0 }
  0xb7   : > { %v509_v51 = vpop.permute.xlu0 %508  ;;  %3349 = vlog2.f32 %v665_v43  ;;  %v3894_v52 = vadd.f32 %v514_v50, %v451_v46 }
  0xb8   : > { %v3896_v53 = vadd.f32 %v509_v51, %v450_v47  ;;  %3351 = vlog2.f32 %v664_v48 }
  0xb9   : > { %3353 = vpow2.f32 %v638_v45  ;;  %v595_v54 = vand.u32 2147483647, %v3894_v52 }
  0xba   : > { %v3342_v55 = vpop.eup %3341  ;;  %3355 = vpow2.f32 %v636_v49  ;;  %v594_v56 = vand.u32 2147483647, %v3896_v53  ;;  %v392_v59 = vpop.permute.xlu1 %391 }
  0xbb   : > { %v387_v61 = vpop.permute.xlu0 %386  ;;  %v697_v0 = vmul.f32 0.6931472, %v3342_v55  ;;  %v611_v1 = vsub.f32 0.0, %v595_v54  ;;  %v449_v8 = vmul.f32 %v392_v59, %v337_v60 }
  0xbc   : > { %v3344_v3 = vpop.eup %3343  ;;  %v610_v4 = vsub.f32 0.0, %v594_v56  ;;  %v448_v9 = vmul.f32 %v387_v61, %v336_v62  ;;  %v333_v62 = vld [vmem:[%s3858_s29 + $0x8] sm:$0xff] }
  0xbd   : > { %v3346_v5 = vpop.eup %3345  ;;  %v714_v6 = vadd.f32 %v697_v0, %v586_v63  ;;  %v663_v7 = vadd.f32 1.0, %v3344_v3  ;;  %v634_v15 = vmul.f32 1.442695, %v611_v1  ;;  %v332_v0 = vld [vmem:[%s3858_s29] sm:$0xff] }
  0xbe   : > { %v3348_v12 = vpop.eup %3347  ;;  %v662_v14 = vadd.f32 1.0, %v3346_v5  ;;  %v504_v16 = vpop.permute.xlu1 %503  ;;  %v632_v21 = vmul.f32 1.442695, %v610_v4 }
  0xbf   : > { %v499_v17 = vpop.permute.xlu0 %498  ;;  %3357 = vtanh.f32 %v714_v6  ;;  %v699_v18 = vmul.f32 0.6931472, %v3348_v12  ;;  %v3904_v19 = vadd.f32 %v504_v16, %v449_v8  ;;  %v583_v12 = vmax.f32 %v3878_v10, 0.0 }
  0xc0   : > { %v3906_v20 = vadd.f32 %v499_v17, %v448_v9  ;;  %3359 = vlog2.f32 %v663_v7 }
  0xc1   : > { %v715_v22 = vadd.f32 %v699_v18, %v587_v13  ;;  %3361 = vlog2.f32 %v662_v14  ;;  %v593_v23 = vand.u32 2147483647, %v3904_v19  ;;  %v582_v14 = vmax.f32 %v3880_v11, 0.0 }
  0xc2   : > { %3363 = vpow2.f32 %v634_v15  ;;  %v592_v24 = vand.u32 2147483647, %v3906_v20  ;;  %v382_v25 = vpop.permute.xlu1 %381 }
  0xc3   : > { %v377_v27 = vpop.permute.xlu0 %376  ;;  %3365 = vtanh.f32 %v715_v22  ;;  %v609_v28 = vsub.f32 0.0, %v593_v23  ;;  %v447_v39 = vmul.f32 %v382_v25, %v335_v26 }
  0xc4   : > { %v3350_v32 = vpop.eup %3349  ;;  %3367 = vpow2.f32 %v632_v21  ;;  %v608_v33 = vsub.f32 0.0, %v592_v24  ;;  %v446_v45 = vmul.f32 %v377_v27, %v334_v29  ;;  %v3273_v27 = vld [vmem:[%s4970_s3 + $0x60] sm:$0xff]  }
  0xc5   : > { %v3352_v34 = vpop.eup %3351  ;;  %v695_v36 = vmul.f32 0.6931472, %v3350_v32  ;;  %v630_v37 = vmul.f32 1.442695, %v609_v28  ;;  %3019 = vmatprep.mubr.bf16.mxu0 %v3273_v27 }
  0xc6   : > { %v3354_v40 = vpop.eup %3353  ;;  %v693_v42 = vmul.f32 0.6931472, %v3352_v34  ;;  %v628_v43 = vmul.f32 1.442695, %v608_v33  ;;  %v494_v46 = vpop.permute.xlu1 %493 }
  0xc7   : > { %v489_v47 = vpop.permute.xlu0 %488  ;;  %v3356_v48 = vpop.eup %3355  ;;  %v713_v49 = vadd.f32 %v695_v36, %v585_v35  ;;  %v661_v50 = vadd.f32 1.0, %v3354_v40  ;;  %3369 = vpow2.f32 %v630_v37  ;;  %v3914_v51 = vadd.f32 %v494_v46, %v447_v39 }
  0xc8   : > { %v712_v54 = vadd.f32 %v693_v42, %v584_v41  ;;  %v660_v55 = vadd.f32 1.0, %v3356_v48  ;;  %3371 = vpow2.f32 %v628_v43  ;;  %v3916_v56 = vadd.f32 %v489_v47, %v446_v45 }
  0xc9   : > { %3373 = vtanh.f32 %v713_v49  ;;  %v591_v59 = vand.u32 2147483647, %v3914_v51 }
  0xca   : > { %3375 = vtanh.f32 %v712_v54  ;;  %v590_v60 = vand.u32 2147483647, %v3916_v56  ;;  %v372_v61 = vpop.permute.xlu1 %371 }
  0xcb   : > { %v367_v63 = vpop.permute.xlu0 %366  ;;  %3377 = vlog2.f32 %v661_v50  ;;  %v607_v1 = vsub.f32 0.0, %v591_v59  ;;  %v445_v7 = vmul.f32 %v372_v61, %v333_v62  ;;  %v581_v59 = vmax.f32 %v3886_v30, 0.0 }
  0xcc   : > { %v3358_v3 = vpop.eup %3357  ;;  %3379 = vlog2.f32 %v660_v55  ;;  %v606_v4 = vsub.f32 0.0, %v590_v60  ;;  %v444_v8 = vmul.f32 %v367_v63, %v332_v0  ;;  %v580_v61 = vmax.f32 %v3888_v31, 0.0 }
  0xcd   : > { %v3360_v5 = vpop.eup %3359  ;;  %v626_v6 = vmul.f32 1.442695, %v607_v1  ;;  %v746_v29 = vmul.f32 %v3358_v3, %v3862_v38 }
  0xce   : > { %v3362_v9 = vpop.eup %3361  ;;  %v691_v13 = vmul.f32 0.6931472, %v3360_v5  ;;  %v624_v15 = vmul.f32 1.442695, %v606_v4  ;;  %v484_v16 = vpop.permute.xlu1 %483 }
  0xcf   : > { %v479_v17 = vpop.permute.xlu0 %478  ;;  %v3364_v18 = vpop.eup %3363  ;;  %v689_v21 = vmul.f32 0.6931472, %v3362_v9  ;;  %3381 = vpow2.f32 %v626_v6  ;;  %v3924_v22 = vadd.f32 %v484_v16, %v445_v7  ;;  %v578_v16 = vmax.f32 %v3896_v53, 0.0 }
  0xd0   : > { %v3926_v23 = vadd.f32 %v479_v17, %v444_v8  ;;  %v3366_v24 = vpop.eup %3365  ;;  %v711_v25 = vadd.f32 %v691_v13, %v583_v12  ;;  %v659_v26 = vadd.f32 1.0, %v3364_v18  ;;  %3383 = vpow2.f32 %v624_v15 }
  0xd1   : > { %v3368_v28 = vpop.eup %3367  ;;  %v747_v32 = vmul.f32 %v3366_v24, %v3865_v44  ;;  %v710_v33 = vadd.f32 %v689_v21, %v582_v14  ;;  %v589_v34 = vand.u32 2147483647, %v3924_v22  ;;  %v579_v14 = vmax.f32 %v3894_v52, 0.0 }
  0xd2   : > { %3385 = vtanh.f32 %v711_v25  ;;  %v658_v35 = vadd.f32 1.0, %v3368_v28  ;;  %v588_v36 = vand.u32 2147483647, %v3926_v23  ;;  %v577_v28 = vmax.f32 %v3904_v19, 0.0 }
  0xd3   : > { %3387 = vtanh.f32 %v710_v33  ;;  %v605_v37 = vsub.f32 0.0, %v589_v34  ;;  %v3198_v39 = vpack.i.bf16 %v747_v32, %v746_v29  ;;  %v866_v42 = vpack.c.bf16 %v747_v32, %v746_v29 }
  0xd4   : > { %v3370_v40 = vpop.eup %3369  ;;  %3389 = vlog2.f32 %v659_v26  ;;  %v604_v41 = vsub.f32 0.0, %v588_v36  ;;  %v576_v29 = vmax.f32 %v3906_v20, 0.0 }
  0xd5   : > { %v3372_v43 = vpop.eup %3371  ;;  %3391 = vlog2.f32 %v658_v35  ;;  %v657_v38 = vadd.f32 1.0, %v3370_v40  ;;  %v622_v45 = vmul.f32 1.442695, %v605_v37  ;;  %3199 = vrot.lane.b32.xlu1 %v3198_v39, %s3652_s17  ;;  %3194 = vrot.lane.b32.xlu0 %v3198_v39, %s3653_s21 }
  0xd6   : > { %v3374_v44 = vpop.eup %3373  ;;  %v656_v46 = vadd.f32 1.0, %v3372_v43  ;;  %v620_v47 = vmul.f32 1.442695, %v604_v41  ;;  %3003 = vmatprep.subr.bf16.mxu0 %v866_v42 }
  0xd7   : > { %v3376_v48 = vpop.eup %3375  ;;  %v745_v49 = vmul.f32 %v3374_v44, %v3870_v57  ;;  %3393 = vlog2.f32 %v657_v38  ;;  %3004 = vmatpush3.bf16.msra.mxu0 %v866_v42 }
  0xd8   : > { %v3378_v50 = vpop.eup %3377  ;;  %v744_v54 = vmul.f32 %v3376_v48, %v3872_v58  ;;  %3395 = vlog2.f32 %v656_v46  ;;  %v574_v46 = vmax.f32 %v3916_v56, 0.0 }
  0xd9   : > { %v3380_v55 = vpop.eup %3379  ;;  %v687_v60 = vmul.f32 0.6931472, %v3378_v50  ;;  %3397 = vpow2.f32 %v622_v45  ;;  %v575_v45 = vmax.f32 %v3914_v51, 0.0 }
  0xda   : > { %v685_v62 = vmul.f32 0.6931472, %v3380_v55  ;;  %3399 = vpow2.f32 %v620_v47  ;;  %v3208_v63 = vpack.i.bf16 %v745_v49, %v744_v54  ;;  %v865_v1 = vpack.c.bf16 %v745_v49, %v744_v54 }
  0xdb   : > { %v709_v0 = vadd.f32 %v687_v60, %v581_v59 }
  0xdc   : > { %v3382_v3 = vpop.eup %3381  ;;  %v708_v57 = vadd.f32 %v685_v62, %v580_v61  ;;  %3209 = vrot.lane.b32.xlu1 %v3208_v63, %s3652_s17  ;;  %3204 = vrot.lane.b32.xlu0 %v3208_v63, %s3653_s21 }
  0xdd   : > { %v3384_v58 = vpop.eup %3383  ;;  %3401 = vtanh.f32 %v709_v0  ;;  %v655_v4 = vadd.f32 1.0, %v3382_v3  ;;  %3005 = vmatprep.subr.bf16.mxu0 %v865_v1 }
  0xde   : > { %3403 = vtanh.f32 %v708_v57  ;;  %v654_v5 = vadd.f32 1.0, %v3384_v58  ;;  %3006 = vmatpush3.bf16.msra.mxu0 %v865_v1  ;;  %v573_v58 = vmax.f32 %v3924_v22, 0.0 }
  0xdf   : > { %v3386_v6 = vpop.eup %3385  ;;  %3405 = vlog2.f32 %v655_v4 }
  0xe0   : > { %v3388_v7 = vpop.eup %3387  ;;  %v743_v8 = vmul.f32 %v3386_v6, %v3878_v10  ;;  %3407 = vlog2.f32 %v654_v5  ;;  %v572_v5 = vmax.f32 %v3926_v23, 0.0 }
  0xe1   : > { %v3390_v9 = vpop.eup %3389  ;;  %v742_v12 = vmul.f32 %v3388_v7, %v3880_v11 }
  0xe2   : > { %v3392_v13 = vpop.eup %3391  ;;  %v683_v15 = vmul.f32 0.6931472, %v3390_v9 }
  0xe3   : > { %v681_v17 = vmul.f32 0.6931472, %v3392_v13  ;;  %v3218_v18 = vpack.i.bf16 %v743_v8, %v742_v12  ;;  %v864_v21 = vpack.c.bf16 %v743_v8, %v742_v12 }
  0xe4   : > { %v3394_v24 = vpop.eup %3393  ;;  %v707_v25 = vadd.f32 %v683_v15, %v579_v14 }
  0xe5   : > { %v3396_v26 = vpop.eup %3395  ;;  %v706_v27 = vadd.f32 %v681_v17, %v578_v16  ;;  %v679_v10 = vmul.f32 0.6931472, %v3394_v24  ;;  %3219 = vrot.lane.b32.xlu1 %v3218_v18, %s3652_s17  ;;  %3214 = vrot.lane.b32.xlu0 %v3218_v18, %s3653_s21  ;;  %v3285_v16 = vld [vmem:[%s4970_s3] sm:$0xff]   ;;  %v1594_v24 = vld [vmem:[%s4971_s4 + $0x78] sm:$0xff] }
  0xe6   : > { %v3398_v11 = vpop.eup %3397  ;;  %3409 = vtanh.f32 %v707_v25  ;;  %v677_v32 = vmul.f32 0.6931472, %v3396_v26  ;;  %3007 = vmatprep.subr.bf16.mxu0 %v864_v21  ;;  %3059 = vmatprep.mubr.bf16.mxu1 %v3285_v16  ;;  %v1593_v25 = vld [vmem:[%s4971_s4 + $0x70] sm:$0xff]  ;;  %v1762_v26 = vld [vmem:[%s4972_s5 + $0x78] sm:$0xff] }
  0xe7   : > { %v3400_v33 = vpop.eup %3399  ;;  %3411 = vtanh.f32 %v706_v27  ;;  %v705_v34 = vadd.f32 %v679_v10, %v577_v28  ;;  %v653_v35 = vadd.f32 1.0, %v3398_v11  ;;  %3008 = vmatpush3.bf16.msra.mxu0 %v864_v21  ;;  %v1761_v27 = vld [vmem:[%s4972_s5 + $0x70] sm:$0xff]  ;;  %v1592_v28 = vld [vmem:[%s4971_s4 + $0x68] sm:$0xff]  ;;  %v1591_v10 = vld [vmem:[%s4971_s4 + $0x60] sm:$0xff] }
  0xe8   : > { %v704_v36 = vadd.f32 %v677_v32, %v576_v29  ;;  %v652_v37 = vadd.f32 1.0, %v3400_v33  ;;  %v3276_v11 = vld [vmem:[%s4970_s3 + $0x78] sm:$0xff]   ;;  %v3277_v29 = vld [vmem:[%s4970_s3 + $0x80] sm:$0xff]   ;;  %v1929_v33 = vld [vmem:[%s4973_s6 + $0x70] sm:$0xff] }
  0xe9   : > { %3413 = vtanh.f32 %v705_v34  ;;  %v1930_v32 = vld [vmem:[%s4973_s6 + $0x78] sm:$0xff]  ;;  %v1760_v34 = vld [vmem:[%s4972_s5 + $0x68] sm:$0xff]  ;;  %v1921_v16 = vld [vmem:[%s4973_s6 + $0x30] sm:$0xff] }
  0xea   : > { %v3402_v39 = vpop.eup %3401  ;;  %3415 = vtanh.f32 %v704_v36  ;;  %v3278_v36 = vld [vmem:[%s4970_s3 + $0x88] sm:$0xff]  }
  0xeb   : > { %v3404_v40 = vpop.eup %3403  ;;  %v741_v41 = vmul.f32 %v3402_v39, %v3886_v30  ;;  %3417 = vlog2.f32 %v653_v35  ;;  %v1759_v35 = vld [vmem:[%s4972_s5 + $0x60] sm:$0xff]  ;;  %v1590_v39 = vld [vmem:[%s4971_s4 + $0x58] sm:$0xff] }
  0xec   : > { %v3406_v42 = vpop.eup %3405  ;;  %v740_v43 = vmul.f32 %v3404_v40, %v3888_v31  ;;  %3419 = vlog2.f32 %v652_v37  ;;  %v3279_v37 = vld [vmem:[%s4970_s3 + $0x90] sm:$0xff]  }
  0xed   : > { %v3408_v38 = vpop.eup %3407  ;;  %v675_v44 = vmul.f32 0.6931472, %v3406_v42  ;;  %v1589_v40 = vld [vmem:[%s4971_s4 + $0x50] sm:$0xff]  ;;  %v1927_v42 = vld [vmem:[%s4973_s6 + $0x60] sm:$0xff] }
  0xee   : > { %v673_v47 = vmul.f32 0.6931472, %v3408_v38  ;;  %v3228_v48 = vpack.i.bf16 %v741_v41, %v740_v43  ;;  %v863_v49 = vpack.c.bf16 %v741_v41, %v740_v43  ;;  %v1928_v41 = vld [vmem:[%s4973_s6 + $0x68] sm:$0xff]  ;;  %v3280_v43 = vld [vmem:[%s4970_s3 + $0x98] sm:$0xff]   ;;  %v3281_v38 = vld [vmem:[%s4970_s3 + $0xa0] sm:$0xff]  }
  0xef   : > { %v703_v50 = vadd.f32 %v675_v44, %v575_v45  ;;  %v1758_v45 = vld [vmem:[%s4972_s5 + $0x58] sm:$0xff]  ;;  %v1757_v44 = vld [vmem:[%s4972_s5 + $0x50] sm:$0xff] }
  0xf0   : > { %v702_v54 = vadd.f32 %v673_v47, %v574_v46  ;;  %3229 = vrot.lane.b32.xlu1 %v3228_v48, %s3652_s17  ;;  %3224 = vrot.lane.b32.xlu0 %v3228_v48, %s3653_s21  ;;  %v1588_v46 = vld [vmem:[%s4971_s4 + $0x48] sm:$0xff]  ;;  %v1587_v47 = vld [vmem:[%s4971_s4 + $0x40] sm:$0xff] }
  0xf1   : > { %3421 = vtanh.f32 %v703_v50  ;;  %3009 = vmatprep.subr.bf16.mxu0 %v863_v49  ;;  %v3282_v48 = vld [vmem:[%s4970_s3 + $0xa8] sm:$0xff]   ;;  %v1926_v50 = vld [vmem:[%s4973_s6 + $0x58] sm:$0xff] }
  0xf2   : > { %3423 = vtanh.f32 %v702_v54  ;;  %3010 = vmatpush3.bf16.msra.mxu0 %v863_v49  ;;  %v3283_v49 = vld [vmem:[%s4970_s3 + $0xb0] sm:$0xff]  }
  0xf3   : > { %v3410_v30 = vpop.eup %3409  ;;  %v1925_v54 = vld [vmem:[%s4973_s6 + $0x50] sm:$0xff] }
  0xf4   : > { %v3412_v31 = vpop.eup %3411  ;;  %v739_v55 = vmul.f32 %v3410_v30, %v3894_v52  ;;  %v1756_v30 = vld [vmem:[%s4972_s5 + $0x48] sm:$0xff] }
  0xf5   : > { %v738_v59 = vmul.f32 %v3412_v31, %v3896_v53  ;;  %v1755_v31 = vld [vmem:[%s4972_s5 + $0x40] sm:$0xff] }
  0xf6   : > { %v3414_v60 = vpop.eup %3413 }
  0xf7   : > { %v3416_v61 = vpop.eup %3415  ;;  %v737_v62 = vmul.f32 %v3414_v60, %v3904_v19  ;;  %v3238_v63 = vpack.i.bf16 %v739_v55, %v738_v59  ;;  %v862_v0 = vpack.c.bf16 %v739_v55, %v738_v59  ;;  %v3284_v55 = vld [vmem:[%s4970_s3 + $0xb8] sm:$0xff]   ;;  %v748_v59 = vlaneseq  ;;  %v3286_v60 = vld [vmem:[%s4970_s3 + $0xc0] sm:$0xff]  }
  0xf8   : > { %v3418_v1 = vpop.eup %3417  ;;  %v736_v3 = vmul.f32 %v3416_v61, %v3906_v20  ;;  %v1586_v61 = vld [vmem:[%s4971_s4 + $0x38] sm:$0xff] }
  0xf9   : > { %v3420_v57 = vpop.eup %3419  ;;  %v671_v4 = vmul.f32 0.6931472, %v3418_v1  ;;  %3239 = vrot.lane.b32.xlu1 %v3238_v63, %s3652_s17  ;;  %3234 = vrot.lane.b32.xlu0 %v3238_v63, %s3653_s21  ;;  %v749_v63 = vand.u32 127, %v748_v59  ;;  %v1923_v1 = vld [vmem:[%s4973_s6 + $0x40] sm:$0xff] }
  0xfa   : > { %v669_v52 = vmul.f32 0.6931472, %v3420_v57  ;;  %3011 = vmatprep.subr.bf16.mxu0 %v862_v0  ;;  %v3248_v53 = vpack.i.bf16 %v737_v62, %v736_v3  ;;  %v861_v6 = vpack.c.bf16 %v737_v62, %v736_v3  ;;  %v1585_v62 = vld [vmem:[%s4971_s4 + $0x30] sm:$0xff] }
  0xfb   : > { %v701_v19 = vadd.f32 %v671_v4, %v573_v58  ;;  %3012 = vmatpush3.bf16.msra.mxu0 %v862_v0  ;;  %v1924_v0 = vld [vmem:[%s4973_s6 + $0x48] sm:$0xff]  ;;  %v782_v3 = vadd.s32 4294967295, %v749_v63  ;;  %v1301_v57 = vadd.s32 1, %v749_v63  ;;  %v1754_v58 = vld [vmem:[%s4972_s5 + $0x38] sm:$0xff]  ;;  %v1753_v4 = vld [vmem:[%s4972_s5 + $0x30] sm:$0xff] }
  0xfc   : > { %v700_v7 = vadd.f32 %v669_v52, %v572_v5  ;;  %3013 = vmatprep.subr.bf16.mxu0 %v861_v6 }
  0xfd   : > { %3425 = vtanh.f32 %v701_v19  ;;  %3249 = vrot.lane.b32.xlu1 %v3248_v53, %s3652_s17  ;;  %3244 = vrot.lane.b32.xlu0 %v3248_v53, %s3653_s21  ;;  %vm783_vm0 = vcmp.ge.s32.totalorder %v782_v3, 0  ;;  %vm1303_vm1 = vcmp.lt.s32.totalorder %v1301_v57, 128  ;;  %v1602_v57 = vld [vmem:[%s4971_s4 + $0xb8] sm:$0xff] }
  0xfe   : > { %v3422_v20 = vpop.eup %3421  ;;  %3427 = vtanh.f32 %v700_v7  ;;  %vm4104_vm2 = vmpackc.low %vm783_vm0, %vm783_vm0 }
  0xff   : > { %v3424_v8 = vpop.eup %3423  ;;  %v735_v9 = vmul.f32 %v3422_v20, %v3914_v51  ;;  %3014 = vmatpush3.bf16.msra.mxu0 %v861_v6  ;;  %v1584_v20 = vld [vmem:[%s4971_s4 + $0x28] sm:$0xff]  ;;  %vm4108_vm3 = vmpackc.low %vm1303_vm1, %vm1303_vm1 }
 0x100   : > { %v734_v12 = vmul.f32 %v3424_v8, %v3916_v56  ;;  %v1583_v8 = vld [vmem:[%s4971_s4 + $0x20] sm:$0xff] }
 0x102   : > { %v3258_v13 = vpack.i.bf16 %v735_v9, %v734_v12  ;;  %v860_v14 = vpack.c.bf16 %v735_v9, %v734_v12  ;;  %v1936_v9 = vld [vmem:[%s4973_s6 + $0xa8] sm:$0xff] }
 0x104   : > { %3259 = vrot.lane.b32.xlu1 %v3258_v13, %s3652_s17  ;;  %3254 = vrot.lane.b32.xlu0 %v3258_v13, %s3653_s21 }
 0x105   : > { %3015 = vmatprep.subr.bf16.mxu0 %v860_v14 }
 0x106   : > { %3016 = vmatpush3.bf16.msra.mxu0 %v860_v14  ;;  %v1935_v14 = vld [vmem:[%s4973_s6 + $0xa0] sm:$0xff] }
 0x10a   : > { %v3426_v15 = vpop.eup %3425 }
 0x10b   : > { %v3428_v17 = vpop.eup %3427  ;;  %v733_v18 = vmul.f32 %v3426_v15, %v3924_v22  ;;  %v3274_v22 = vld [vmem:[%s4970_s3 + $0x68] sm:$0xff]   ;;  %v1922_v15 = vld [vmem:[%s4973_s6 + $0x38] sm:$0xff] }
 0x10c   : > { %v732_v51 = vmul.f32 %v3428_v17, %v3926_v23  ;;  %v3275_v23 = vld [vmem:[%s4970_s3 + $0x70] sm:$0xff]  }
 0x10e   : > { %v3268_v56 = vpack.i.bf16 %v733_v18, %v732_v51  ;;  %v859_v21 = vpack.c.bf16 %v733_v18, %v732_v51 }
 0x110   : > { %3269 = vrot.lane.b32.xlu1 %v3268_v56, %s3652_s17  ;;  %3264 = vrot.lane.b32.xlu0 %v3268_v56, %s3653_s21  ;;  %s4919_s17 = scalar_lea.hbm %s4976_s9, %s2942_s14  ;;  %s3589_s21 = scalar_lea.vmem %s4921_s16, 2048 }
 0x111   : > { %3017 = vmatprep.subr.bf16.mxu0 %v859_v21  ;;  %p3590_p11 = scmp.ne.s32.totalorder %s4921_s16, %s3589_s21  ;;  %p3597_p1 = scmp.lt.s32.totalorder %s3595_s25, %s3589_s21 }
 0x112   : > { %3018 = vmatpush3.bf16.msra.mxu0 %v859_v21 }
 0x113   : > { %p3591_p12 = pnand %p3590_p11, %p3745_p5  ;;  %p3598_p2 = por %p3597_p1, %p3596_p0 }
 0x114   : > { %1680 = vperm.xlu1 %3192, %v1594_v24   ;;  %1675 = vperm.xlu0 %3191, %v1593_v25  }
 0x115   : > { %3020 = vmatmul.mubr.bf16.vlgmr.msra.gmra.mxu0 %v3274_v22  ;;  %p3592_p13 = pneg %p3591_p12 }
 0x116   : > { %3023 = vmatprep.mubr.bf16.mxu0 %v3275_v23  ;;  %v1752_v23 = vld [vmem:[%s4972_s5 + $0x28] sm:$0xff] }
 0x117   : > { %p3599_p3 = pnand %p3598_p2, %p3592_p13 }
 0x118   : > { %1848 = vperm.xlu1 %3192, %v1762_v26   ;;  %1843 = vperm.xlu0 %3191, %v1761_v27   ;;  %v1751_v26 = vld [vmem:[%s4972_s5 + $0x20] sm:$0xff]  ;;  %v1582_v27 = vld [vmem:[%s4971_s4 + $0x18] sm:$0xff] }
 0x11c   : > { %1670 = vperm.xlu1 %3192, %v1592_v28   ;;  %1665 = vperm.xlu0 %3191, %v1591_v10   ;;  %v1581_v28 = vld [vmem:[%s4971_s4 + $0x10] sm:$0xff] }
 0x11d   : > { %3024 = vmatmul.mubr.bf16.gmra.mxu0 %v3276_v11 }
 0x11e   : > { %3027 = vmatprep.mubr.bf16.mxu0 %v3277_v29 }
 0x120   : > { %2016 = vperm.xlu1 %3192, %v1930_v32   ;;  %2011 = vperm.xlu0 %3191, %v1929_v33  }
 0x124   : > { %1838 = vperm.xlu1 %3192, %v1760_v34   ;;  %1833 = vperm.xlu0 %3191, %v1759_v35   ;;  %v1920_v35 = vld [vmem:[%s4973_s6 + $0x28] sm:$0xff] }
 0x125   : > { %3028 = vmatmul.mubr.bf16.gmra.mxu0 %v3278_v36  ;;  %v1919_v36 = vld [vmem:[%s4973_s6 + $0x20] sm:$0xff] }
 0x126   : > { %3031 = vmatprep.mubr.bf16.mxu0 %v3279_v37 }
 0x128   : > { %1660 = vperm.xlu1 %3192, %v1590_v39   ;;  %1655 = vperm.xlu0 %3191, %v1589_v40   ;;  %v1750_v40 = vld [vmem:[%s4972_s5 + $0x18] sm:$0xff] }
 0x12c   : > { %2006 = vperm.xlu1 %3192, %v1928_v41   ;;  %2001 = vperm.xlu0 %3191, %v1927_v42   ;;  %v1749_v41 = vld [vmem:[%s4972_s5 + $0x10] sm:$0xff]  ;;  %v1580_v42 = vld [vmem:[%s4971_s4 + $0x8] sm:$0xff] }
 0x12d   : > { %3032 = vmatmul.mubr.bf16.gmra.mxu0 %v3280_v43  ;;  %v1579_v43 = vld [vmem:[%s4971_s4] sm:$0xff] }
 0x12e   : > { %3035 = vmatprep.mubr.bf16.mxu0 %v3281_v38 }
 0x130   : > { %1828 = vperm.xlu1 %3192, %v1758_v45   ;;  %1823 = vperm.xlu0 %3191, %v1757_v44  }
 0x134   : > { %1650 = vperm.xlu1 %3192, %v1588_v46   ;;  %1645 = vperm.xlu0 %3191, %v1587_v47  }
 0x135   : > { %3036 = vmatmul.mubr.bf16.gmra.mxu0 %v3282_v48 }
 0x136   : > { %3039 = vmatprep.mubr.bf16.mxu0 %v3283_v49 }
 0x138   : > { %1996 = vperm.xlu1 %3192, %v1926_v50   ;;  %1991 = vperm.xlu0 %3191, %v1925_v54   ;;  %v1918_v54 = vld [vmem:[%s4973_s6 + $0x18] sm:$0xff] }
 0x13c   : > { %1818 = vperm.xlu1 %3192, %v1756_v30   ;;  %1813 = vperm.xlu0 %3191, %v1755_v31   ;;  %v1917_v30 = vld [vmem:[%s4973_s6 + $0x10] sm:$0xff]  ;;  %v1748_v31 = vld [vmem:[%s4972_s5 + $0x8] sm:$0xff] }
 0x13d   : > { %3040 = vmatmul.mubr.bf16.gmra.mxu0 %v3284_v55  ;;  %v1747_v55 = vld [vmem:[%s4972_s5] sm:$0xff] }
 0x13e   : > { %3099 = vmatprep.mubr.bf16.mxu0 %v3286_v60 }
 0x140   : > { %1640 = vperm.xlu1 %3192, %v1586_v61   ;;  %1635 = vperm.xlu0 %3191, %v1585_v62  }
 0x144   : > { %1986 = vperm.xlu1 %3192, %v1924_v0   ;;  %1981 = vperm.xlu0 %3191, %v1923_v1  }
 0x147   : > { %v3200_v5 = vpop.permute.xlu1 %3199  ;;  %v3195_v52 = vpop.permute.xlu0 %3194 }
 0x148   : > { %1808 = vperm.xlu1 %3192, %v1754_v58   ;;  %1803 = vperm.xlu0 %3191, %v1753_v4   ;;  %v3202_v53 = vunpack.i.h.bf16 %v3200_v5  ;;  %v3201_v6 = vunpack.i.l.bf16 %v3200_v5  ;;  %v3197_v19 = vunpack.i.h.bf16 %v3195_v52  ;;  %v3196_v7 = vunpack.i.l.bf16 %v3195_v52  ;;  %v1601_v58 = vld [vmem:[%s4971_s4 + $0xb0] sm:$0xff] }
 0x14a   : > { %v2889_v12 = vpack.c.bf16 %v3202_v53, %v3201_v6  ;;  %v2829_v13 = vpack.c.bf16 %v3197_v19, %v3196_v7 }
 0x14c   : > { %1630 = vperm.xlu1 %3192, %v1584_v20   ;;  %1625 = vperm.xlu0 %3191, %v1583_v8   ;;  %v1916_v8 = vld [vmem:[%s4973_s6 + $0x8] sm:$0xff] }
 0x14d   : > { %3043 = vmatprep.subr.msk.bf16.mxu1 %vm4104_vm2, %v2829_v13  ;;  %3083 = vmatprep.subr.msk.bf16.mxu0 %vm4108_vm3, %v2889_v12 }
 0x14e   : > { %3044 = vmatpush3.bf16.msk.msra.mxu1 %vm4104_vm2, %v2829_v13  ;;  %v3210_v17 = vpop.permute.xlu1 %3209  ;;  %v3205_v18 = vpop.permute.xlu0 %3204  ;;  %3084 = vmatpush3.bf16.msk.msra.mxu0 %vm4108_vm3, %v2889_v12  ;;  %v1915_v12 = vld [vmem:[%s4973_s6] sm:$0xff]  ;;  %v1770_v13 = vld [vmem:[%s4972_s5 + $0xb8] sm:$0xff] }
 0x14f   : > { %v3212_v51 = vunpack.i.h.bf16 %v3210_v17  ;;  %v3211_v56 = vunpack.i.l.bf16 %v3210_v17  ;;  %v3207_v21 = vunpack.i.h.bf16 %v3205_v18  ;;  %v3206_v24 = vunpack.i.l.bf16 %v3205_v18  ;;  %v1769_v17 = vld [vmem:[%s4972_s5 + $0xb0] sm:$0xff] }
 0x150   : > { %1976 = vperm.xlu1 %3192, %v1922_v15   ;;  %1971 = vperm.xlu0 %3191, %v1921_v16  }
 0x151   : > { %v2892_v25 = vpack.c.bf16 %v3212_v51, %v3211_v56  ;;  %v2832_v22 = vpack.c.bf16 %v3207_v21, %v3206_v24 }
 0x153   : > { %3045 = vmatprep.subr.msk.bf16.mxu1 %vm4104_vm2, %v2832_v22  ;;  %3085 = vmatprep.subr.msk.bf16.mxu0 %vm4108_vm3, %v2892_v25 }
 0x154   : > { %1798 = vperm.xlu1 %3192, %v1752_v23   ;;  %1793 = vperm.xlu0 %3191, %v1751_v26   ;;  %v1599_v23 = vld [vmem:[%s4971_s4 + $0xa0] sm:$0xff]  ;;  %v1938_v26 = vld [vmem:[%s4973_s6 + $0xb8] sm:$0xff] }
 0x155   : > { %3046 = vmatpush3.bf16.msk.msra.mxu1 %vm4104_vm2, %v2832_v22  ;;  %3086 = vmatpush3.bf16.msk.msra.mxu0 %vm4108_vm3, %v2892_v25  ;;  %v1600_v22 = vld [vmem:[%s4971_s4 + $0xa8] sm:$0xff] }
 0x157   : > { %v3220_v10 = vpop.permute.xlu1 %3219  ;;  %v3215_v11 = vpop.permute.xlu0 %3214 }
 0x158   : > { %1620 = vperm.xlu1 %3192, %v1582_v27   ;;  %1615 = vperm.xlu0 %3191, %v1581_v28   ;;  %v3222_v29 = vunpack.i.h.bf16 %v3220_v10  ;;  %v3221_v32 = vunpack.i.l.bf16 %v3220_v10  ;;  %v3217_v33 = vunpack.i.h.bf16 %v3215_v11  ;;  %v3216_v34 = vunpack.i.l.bf16 %v3215_v11  ;;  %v1937_v27 = vld [vmem:[%s4973_s6 + $0xb0] sm:$0xff]  ;;  %v1768_v11 = vld [vmem:[%s4972_s5 + $0xa8] sm:$0xff] }
 0x15a   : > { %v2895_v37 = vpack.c.bf16 %v3222_v29, %v3221_v32  ;;  %v2835_v39 = vpack.c.bf16 %v3217_v33, %v3216_v34 }
 0x15c   : > { %1966 = vperm.xlu1 %3192, %v1920_v35   ;;  %1961 = vperm.xlu0 %3191, %v1919_v36   ;;  %v1767_v35 = vld [vmem:[%s4972_s5 + $0xa0] sm:$0xff] }
 0x15d   : > { %3047 = vmatprep.subr.msk.bf16.mxu1 %vm4104_vm2, %v2835_v39  ;;  %3087 = vmatprep.subr.msk.bf16.mxu0 %vm4108_vm3, %v2895_v37 }
 0x15e   : > { %3048 = vmatpush3.bf16.msk.msra.mxu1 %vm4104_vm2, %v2835_v39  ;;  %3088 = vmatpush3.bf16.msk.msra.mxu0 %vm4108_vm3, %v2895_v37  ;;  %v1598_v39 = vld [vmem:[%s4971_s4 + $0x98] sm:$0xff] }
 0x160   : > { %1788 = vperm.xlu1 %3192, %v1750_v40   ;;  %1783 = vperm.xlu0 %3191, %v1749_v41   ;;  %v1597_v40 = vld [vmem:[%s4971_s4 + $0x90] sm:$0xff]  ;;  %v3287_v41 = vld [vmem:[%s4970_s3 + $0x8] sm:$0xff]  }
 0x162   : > { %v3230_v38 = vpop.permute.xlu1 %3229  ;;  %v3225_v45 = vpop.permute.xlu0 %3224 }
 0x163   : > { %v3232_v44 = vunpack.i.h.bf16 %v3230_v38  ;;  %v3231_v46 = vunpack.i.l.bf16 %v3230_v38  ;;  %v3227_v47 = vunpack.i.h.bf16 %v3225_v45  ;;  %v3226_v48 = vunpack.i.l.bf16 %v3225_v45  ;;  %v3290_v38 = vld [vmem:[%s4970_s3 + $0xd0] sm:$0xff]   ;;  %v1766_v45 = vld [vmem:[%s4972_s5 + $0x98] sm:$0xff] }
 0x164   : > { %1610 = vperm.xlu1 %3192, %v1580_v42   ;;  %1605 = vperm.xlu0 %3191, %v1579_v43   ;;  %v3288_v42 = vld [vmem:[%s4970_s3 + $0xc8] sm:$0xff]   ;;  %v3289_v43 = vld [vmem:[%s4970_s3 + $0x10] sm:$0xff]  }
 0x165   : > { %v2898_v49 = vpack.c.bf16 %v3232_v44, %v3231_v46  ;;  %v2838_v50 = vpack.c.bf16 %v3227_v47, %v3226_v48  ;;  %v1765_v44 = vld [vmem:[%s4972_s5 + $0x90] sm:$0xff]  ;;  %v3291_v46 = vld [vmem:[%s4970_s3 + $0x18] sm:$0xff]   ;;  %v3293_v48 = vld [vmem:[%s4970_s3 + $0x20] sm:$0xff]  }
 0x166   : > { %v3292_v47 = vld [vmem:[%s4970_s3 + $0xd8] sm:$0xff]  }
 0x167   : > { %3049 = vmatprep.subr.msk.bf16.mxu1 %vm4104_vm2, %v2838_v50  ;;  %3089 = vmatprep.subr.msk.bf16.mxu0 %vm4108_vm3, %v2898_v49 }
 0x168   : > { %3050 = vmatpush3.bf16.msk.msra.mxu1 %vm4104_vm2, %v2838_v50  ;;  %1956 = vperm.xlu1 %3192, %v1918_v54   ;;  %v1596_v50 = vld [vmem:[%s4971_s4 + $0x88] sm:$0xff]  ;;  %v1595_v54 = vld [vmem:[%s4971_s4 + $0x80] sm:$0xff] }
 0x169   : > { %1951 = vperm.xlu0 %3191, %v1917_v30   ;;  %3090 = vmatpush3.bf16.msk.msra.mxu0 %vm4108_vm3, %v2898_v49  ;;  %v3294_v49 = vld [vmem:[%s4970_s3 + $0xe0] sm:$0xff]   ;;  %v1934_v30 = vld [vmem:[%s4973_s6 + $0x98] sm:$0xff] }
 0x16b   : > { %v3240_v59 = vpop.permute.xlu1 %3239  ;;  %v3235_v60 = vpop.permute.xlu0 %3234 }
 0x16c   : > { %v3242_v61 = vunpack.i.h.bf16 %v3240_v59  ;;  %v3241_v62 = vunpack.i.l.bf16 %v3240_v59  ;;  %v3237_v63 = vunpack.i.h.bf16 %v3235_v60  ;;  %v3236_v0 = vunpack.i.l.bf16 %v3235_v60  ;;  %1778 = vperm.xlu1 %3192, %v1748_v31   ;;  %v1933_v31 = vld [vmem:[%s4973_s6 + $0x90] sm:$0xff]  ;;  %v3296_v59 = vld [vmem:[%s4970_s3 + $0xe8] sm:$0xff]  }
 0x16d   : > { %1773 = vperm.xlu0 %3191, %v1747_v55   ;;  %v3295_v55 = vld [vmem:[%s4970_s3 + $0x28] sm:$0xff]   ;;  %v3297_v60 = vld [vmem:[%s4970_s3 + $0x30] sm:$0xff]  }
 0x16e   : > { %v2901_v1 = vpack.c.bf16 %v3242_v61, %v3241_v62  ;;  %v2841_v3 = vpack.c.bf16 %v3237_v63, %v3236_v0  ;;  %v3298_v61 = vld [vmem:[%s4970_s3 + $0xf0] sm:$0xff]   ;;  %v1764_v62 = vld [vmem:[%s4972_s5 + $0x88] sm:$0xff]  ;;  %v1763_v63 = vld [vmem:[%s4972_s5 + $0x80] sm:$0xff] }
 0x16f   : > { %v3250_v4 = vpop.permute.xlu1 %3249  ;;  %v3245_v5 = vpop.permute.xlu0 %3244  ;;  %v1932_v0 = vld [vmem:[%s4973_s6 + $0x88] sm:$0xff] }
 0x170   : > { %3051 = vmatprep.subr.msk.bf16.mxu1 %vm4104_vm2, %v2841_v3  ;;  %3091 = vmatprep.subr.msk.bf16.mxu0 %vm4108_vm3, %v2901_v1  ;;  %v3252_v52 = vunpack.i.h.bf16 %v3250_v4  ;;  %v3251_v53 = vunpack.i.l.bf16 %v3250_v4  ;;  %v3247_v6 = vunpack.i.h.bf16 %v3245_v5  ;;  %v3246_v19 = vunpack.i.l.bf16 %v3245_v5  ;;  %v3303_v4 = vld [vmem:[%s4970_s3 + $0x100] sm:$0xff]   ;;  %v2376_v5 = vld [vmem:[%s4975_s8 + $0x8] sm:$0xff] }
 0x171   : > { %3052 = vmatpush3.bf16.msk.msra.mxu1 %vm4104_vm2, %v2841_v3  ;;  %1720 = vperm.xlu1 %3192, %v1602_v57   ;;  %v3299_v3 = vld [vmem:[%s4970_s3 + $0x38] sm:$0xff]  }
 0x172   : > { %1715 = vperm.xlu0 %3191, %v1601_v58   ;;  %3092 = vmatpush3.bf16.msk.msra.mxu0 %vm4108_vm3, %v2901_v1  ;;  %v2904_v7 = vpack.c.bf16 %v3252_v52, %v3251_v53  ;;  %v2844_v20 = vpack.c.bf16 %v3247_v6, %v3246_v19  ;;  %v1931_v1 = vld [vmem:[%s4973_s6 + $0x80] sm:$0xff]  ;;  %v3300_v57 = vld [vmem:[%s4970_s3 + $0xf8] sm:$0xff]   ;;  %v2377_v6 = vld [vmem:[%s4975_s8 + $0x10] sm:$0xff] }
 0x173   : > { %v3301_v58 = vld [vmem:[%s4970_s3 + $0x40] sm:$0xff]   ;;  %v2378_v53 = vld [vmem:[%s4975_s8 + $0x18] sm:$0xff]  ;;  %v3302_v19 = vld [vmem:[%s4970_s3 + $0x48] sm:$0xff]  }
 0x174   : > { %3053 = vmatprep.subr.msk.bf16.mxu1 %vm4104_vm2, %v2844_v20  ;;  %3093 = vmatprep.subr.msk.bf16.mxu0 %vm4108_vm3, %v2904_v7  ;;  %v2375_v52 = vld [vmem:[%s4975_s8] sm:$0xff] }
 0x175   : > { %1946 = vperm.xlu1 %3192, %v1916_v8   ;;  %3054 = vmatpush3.bf16.msk.msra.mxu1 %vm4104_vm2, %v2844_v20  ;;  %v3305_v20 = vld [vmem:[%s4970_s3 + $0x50] sm:$0xff]  }
 0x176   : > { %1941 = vperm.xlu0 %3191, %v1915_v12   ;;  %3094 = vmatpush3.bf16.msk.msra.mxu0 %vm4108_vm3, %v2904_v7  ;;  %v3260_v15 = vpop.permute.xlu1 %3259  ;;  %v3255_v16 = vpop.permute.xlu0 %3254  ;;  %v3304_v7 = vld [vmem:[%s4970_s3 + $0x108] sm:$0xff]   ;;  %v3307_v8 = vld [vmem:[%s4970_s3 + $0x110] sm:$0xff]  }
 0x177   : > { %v3262_v18 = vunpack.i.h.bf16 %v3260_v15  ;;  %v3261_v51 = vunpack.i.l.bf16 %v3260_v15  ;;  %v3257_v56 = vunpack.i.h.bf16 %v3255_v16  ;;  %v3256_v21 = vunpack.i.l.bf16 %v3255_v16  ;;  %v2380_v12 = vld [vmem:[%s4975_s8 + $0x28] sm:$0xff]  ;;  %v2382_v15 = vld [vmem:[%s4975_s8 + $0x38] sm:$0xff]  ;;  %v2381_v16 = vld [vmem:[%s4975_s8 + $0x30] sm:$0xff] }
 0x179   : > { %1888 = vperm.xlu1 %3192, %v1770_v13   ;;  %v2907_v24 = vpack.c.bf16 %v3262_v18, %v3261_v51  ;;  %v2847_v25 = vpack.c.bf16 %v3257_v56, %v3256_v21  ;;  %v2379_v13 = vld [vmem:[%s4975_s8 + $0x20] sm:$0xff]  ;;  %v3308_v18 = vld [vmem:[%s4970_s3 + $0x118] sm:$0xff]   ;;  %v2384_v51 = vld [vmem:[%s4975_s8 + $0x48] sm:$0xff] }
 0x17a   : > { %1883 = vperm.xlu0 %3191, %v1769_v17   ;;  %v3306_v17 = vld [vmem:[%s4970_s3 + $0x58] sm:$0xff]   ;;  %v2383_v56 = vld [vmem:[%s4975_s8 + $0x40] sm:$0xff] }
 0x17b   : > { %3055 = vmatprep.subr.msk.bf16.mxu1 %vm4104_vm2, %v2847_v25  ;;  %3095 = vmatprep.subr.msk.bf16.mxu0 %vm4108_vm3, %v2907_v24  ;;  %v2386_v21 = vld [vmem:[%s4975_s8 + $0x58] sm:$0xff] }
 0x17c   : > { %3056 = vmatpush3.bf16.msk.msra.mxu1 %vm4104_vm2, %v2847_v25  ;;  %3096 = vmatpush3.bf16.msk.msra.mxu0 %vm4108_vm3, %v2907_v24  ;;  %v2385_v24 = vld [vmem:[%s4975_s8 + $0x50] sm:$0xff]  ;;  %v2388_v25 = vld [vmem:[%s4975_s8 + $0x68] sm:$0xff] }
 0x17d   : > { %1710 = vperm.xlu1 %3192, %v1600_v22   ;;  %v2387_v22 = vld [vmem:[%s4975_s8 + $0x60] sm:$0xff] }
 0x17e   : > { %1705 = vperm.xlu0 %3191, %v1599_v23  }
 0x181   : > { %2056 = vperm.xlu1 %3192, %v1938_v26   ;;  %v2390_v26 = vld [vmem:[%s4975_s8 + $0x78] sm:$0xff] }
 0x182   : > { %2051 = vperm.xlu0 %3191, %v1937_v27   ;;  %v3270_v28 = vpop.permute.xlu1 %3269  ;;  %v3265_v10 = vpop.permute.xlu0 %3264  ;;  %v2389_v27 = vld [vmem:[%s4975_s8 + $0x70] sm:$0xff] }
 0x183   : > { %v3272_v29 = vunpack.i.h.bf16 %v3270_v28  ;;  %v3271_v32 = vunpack.i.l.bf16 %v3270_v28  ;;  %v3267_v33 = vunpack.i.h.bf16 %v3265_v10  ;;  %v3266_v34 = vunpack.i.l.bf16 %v3265_v10 }
 0x185   : > { %v2910_v36 = vpack.c.bf16 %v3272_v29, %v3271_v32  ;;  %v2850_v37 = vpack.c.bf16 %v3267_v33, %v3266_v34  ;;  %1878 = vperm.xlu1 %3192, %v1768_v11  }
 0x186   : > { %1873 = vperm.xlu0 %3191, %v1767_v35  }
 0x187   : > { %3057 = vmatprep.subr.msk.bf16.mxu1 %vm4104_vm2, %v2850_v37  ;;  %3097 = vmatprep.subr.msk.bf16.mxu0 %vm4108_vm3, %v2910_v36 }
 0x188   : > { %3058 = vmatpush3.bf16.msk.msra.mxu1 %vm4104_vm2, %v2850_v37  ;;  %3098 = vmatpush3.bf16.msk.msra.mxu0 %vm4108_vm3, %v2910_v36 }
 0x189   : > { %1700 = vperm.xlu1 %3192, %v1598_v39   ;;  %2568 = vmatprep.subr.bf16.mxu0 %v4977_v2 }
 0x18a   : > { %1695 = vperm.xlu0 %3191, %v1597_v40   ;;  %3123 = vmatprep.subr.bf16.mxu1 %v4977_v2 }
 0x18b   : > { %3060 = vmatmul.mubr.bf16.vlgmr.msra.gmra.mxu1 %v3287_v41  ;;  %3100 = vmatmul.mubr.bf16.vlgmr.msra.gmra.mxu0 %v3288_v42 }
 0x18c   : > { %3063 = vmatprep.mubr.bf16.mxu1 %v3289_v43  ;;  %3103 = vmatprep.mubr.bf16.mxu0 %v3290_v38 }
 0x18d   : > { %2046 = vperm.xlu1 %3192, %v1936_v9  }
 0x18e   : > { %2041 = vperm.xlu0 %3191, %v1935_v14  }
 0x18f   : > { %v4412_v23 = vpop.permute.xlu1 %1680  ;;  %v4420_v28 = vpop.permute.xlu0 %1675 }
 0x190   : > { %4989 = vst [vmem:[#allocation5_spill] sm:$0xff] %v4412_v23  ;;  %4990 = vst [vmem:[#allocation6_spill] sm:$0xff] %v4420_v28 }
 0x191   : > { %1868 = vperm.xlu1 %3192, %v1766_v45  }
 0x192   : > { %1863 = vperm.xlu0 %3191, %v1765_v44  }
 0x193   : > { %3064 = vmatmul.mubr.bf16.gmra.mxu1 %v3291_v46  ;;  %3104 = vmatmul.mubr.bf16.gmra.mxu0 %v3292_v47  ;;  %v4422_v10 = vpop.permute.xlu1 %1848  ;;  %v4424_v11 = vpop.permute.xlu0 %1843 }
 0x194   : > { %3067 = vmatprep.mubr.bf16.mxu1 %v3293_v48  ;;  %3107 = vmatprep.mubr.bf16.mxu0 %v3294_v49  ;;  %4991 = vst [vmem:[#allocation7_spill] sm:$0xff] %v4422_v10  ;;  %4992 = vst [vmem:[#allocation8_spill] sm:$0xff] %v4424_v11 }
 0x195   : > { %1690 = vperm.xlu1 %3192, %v1596_v50  }
 0x196   : > { %1685 = vperm.xlu0 %3191, %v1595_v54  }
 0x197   : > { %v4426_v29 = vpop.permute.xlu1 %1670  ;;  %v4428_v32 = vpop.permute.xlu0 %1665 }
 0x198   : > { %4993 = vst [vmem:[#allocation9_spill] sm:$0xff] %v4426_v29  ;;  %4994 = vst [vmem:[#allocation10_spill] sm:$0xff] %v4428_v32 }
 0x199   : > { %2036 = vperm.xlu1 %3192, %v1934_v30  }
 0x19a   : > { %2031 = vperm.xlu0 %3191, %v1933_v31  }
 0x19b   : > { %3068 = vmatmul.mubr.bf16.gmra.mxu1 %v3295_v55  ;;  %3108 = vmatmul.mubr.bf16.gmra.mxu0 %v3296_v59  ;;  %v4430_v33 = vpop.permute.xlu1 %2016  ;;  %v4432_v34 = vpop.permute.xlu0 %2011 }
 0x19c   : > { %3071 = vmatprep.mubr.bf16.mxu1 %v3297_v60  ;;  %3111 = vmatprep.mubr.bf16.mxu0 %v3298_v61  ;;  %4995 = vst [vmem:[#allocation11_spill] sm:$0xff] %v4430_v33  ;;  %4996 = vst [vmem:[#allocation12_spill] sm:$0xff] %v4432_v34 }
 0x19d   : > { %1858 = vperm.xlu1 %3192, %v1764_v62  }
 0x19e   : > { %1853 = vperm.xlu0 %3191, %v1763_v63  }
 0x19f   : > { %v4434_v35 = vpop.permute.xlu1 %1838  ;;  %v4436_v36 = vpop.permute.xlu0 %1833 }
 0x1a0   : > { %4997 = vst [vmem:[#allocation13_spill] sm:$0xff] %v4434_v35  ;;  %4998 = vst [vmem:[#allocation14_spill] sm:$0xff] %v4436_v36 }
 0x1a1   : > { %2026 = vperm.xlu1 %3192, %v1932_v0  }
 0x1a2   : > { %2021 = vperm.xlu0 %3191, %v1931_v1  }
 0x1a3   : > { %3072 = vmatmul.mubr.bf16.gmra.mxu1 %v3299_v3  ;;  %3112 = vmatmul.mubr.bf16.gmra.mxu0 %v3300_v57  ;;  %v4438_v37 = vpop.permute.xlu1 %1660  ;;  %v4440_v39 = vpop.permute.xlu0 %1655 }
 0x1a4   : > { %3075 = vmatprep.mubr.bf16.mxu1 %v3301_v58  ;;  %3115 = vmatprep.mubr.bf16.mxu0 %v3303_v4 }
 0x1a5   : > { %2398 = vperm.xlu1 %3192, %v2376_v5  }
 0x1a6   : > { %2393 = vperm.xlu0 %3191, %v2375_v52  }
 0x1a7   : > { %v4442_v40 = vpop.permute.xlu1 %2006  ;;  %v4444_v41 = vpop.permute.xlu0 %2001 }
 0x1a8   : > { %4999 = vst [vmem:[#allocation15_spill] sm:$0xff] %v4442_v40  ;;  %5000 = vst [vmem:[#allocation16_spill] sm:$0xff] %v4444_v41 }
 0x1a9   : > { %2408 = vperm.xlu1 %3192, %v2378_v53  }
 0x1aa   : > { %2403 = vperm.xlu0 %3191, %v2377_v6  }
 0x1ab   : > { %3076 = vmatmul.mubr.bf16.gmra.mxu1 %v3302_v19  ;;  %3116 = vmatmul.mubr.bf16.gmra.mxu0 %v3304_v7  ;;  %v4446_v42 = vpop.permute.xlu1 %1828  ;;  %v4448_v43 = vpop.permute.xlu0 %1823 }
 0x1ac   : > { %3079 = vmatprep.mubr.bf16.mxu1 %v3305_v20  ;;  %3119 = vmatprep.mubr.bf16.mxu0 %v3307_v8 }
 0x1ad   : > { %2418 = vperm.xlu1 %3192, %v2380_v12  }
 0x1ae   : > { %2413 = vperm.xlu0 %3191, %v2379_v13  }
 0x1af   : > { %v4450_v38 = vpop.permute.xlu1 %1650  ;;  %v4452_v14 = vpop.permute.xlu0 %1645 }
 0x1b1   : > { %2428 = vperm.xlu1 %3192, %v2382_v15  }
 0x1b2   : > { %2423 = vperm.xlu0 %3191, %v2381_v16  }
 0x1b3   : > { %3080 = vmatmul.mubr.bf16.gmra.mxu1 %v3306_v17  ;;  %3120 = vmatmul.mubr.bf16.gmra.mxu0 %v3308_v18  ;;  %v4456_v44 = vpop.permute.xlu1 %1996  ;;  %v4460_v47 = vpop.permute.xlu0 %1991 }
 0x1b4   : > { %5001 = vst [vmem:[#allocation17_spill] sm:$0xff] %v4456_v44 }
 0x1b5   : > { %2438 = vperm.xlu1 %3192, %v2384_v51  }
 0x1b6   : > { %2433 = vperm.xlu0 %3191, %v2383_v56  }
 0x1b7   : > { %v4462_v48 = vpop.permute.xlu1 %1818  ;;  %v4466_v50 = vpop.permute.xlu0 %1813 }
 0x1b8   : > { %5002 = vst [vmem:[#allocation18_spill] sm:$0xff] %v4462_v48 }
 0x1b9   : > { %2448 = vperm.xlu1 %3192, %v2386_v21  }
 0x1ba   : > { %2443 = vperm.xlu0 %3191, %v2385_v24  }
 0x1bb   : > { %v4470_v30 = vpop.permute.xlu1 %1640  ;;  %v4474_v55 = vpop.permute.xlu0 %1635 }
 0x1bd   : > { %2458 = vperm.xlu1 %3192, %v2388_v25  }
 0x1be   : > { %2453 = vperm.xlu0 %3191, %v2387_v22  }
 0x1bf   : > { %v4476_v59 = vpop.permute.xlu1 %1986  ;;  %v4480_v61 = vpop.permute.xlu0 %1981 }
 0x1c0   : > { %5003 = vst [vmem:[#allocation19_spill] sm:$0xff] %v4476_v59 }
 0x1c1   : > { %2468 = vperm.xlu1 %3192, %v2390_v26  }
 0x1c2   : > { %2463 = vperm.xlu0 %3191, %v2389_v27  }
 0x1c3   : > { %v4484_v63 = vpop.permute.xlu1 %1808  ;;  %v4488_v1 = vpop.permute.xlu0 %1803 }
 0x1c7   : > { %v4490_v3 = vpop.permute.xlu1 %1630  ;;  %v4494_v58 = vpop.permute.xlu0 %1625 }
 0x1c8   : > { %5004 = vst [vmem:[#allocation20_spill] sm:$0xff] %v4490_v3 }
 0x1cb   : > { %v4498_v5 = vpop.permute.xlu1 %1976  ;;  %v4502_v53 = vpop.permute.xlu0 %1971 }
 0x1cf   : > { %v4504_v6 = vpop.permute.xlu1 %1798  ;;  %v4508_v7 = vpop.permute.xlu0 %1793 }
 0x1d0   : > { %5005 = vst [vmem:[#allocation21_spill] sm:$0xff] %v4504_v6 }
 0x1d3   : > { %v1621_v8 = vpop.permute.xlu1 %1620  ;;  %v1616_v13 = vpop.permute.xlu0 %1615 }
 0x1d5   : > { %v3021_v9 = vpop.f32.mrf.mxu0 }
 0x1d7   : > { %v4454_v45 = vpop.f32.mrf.mxu0  ;;  %v4514_v15 = vpop.permute.xlu1 %1966 }
 0x1d8   : > { %5007 = vst [vmem:[#allocation23_spill] sm:$0xff] %v4514_v15  ;;  %v4518_v17 = vpop.permute.xlu0 %1961 }
 0x1d9   : > { %v4458_v46 = vpop.f32.mrf.mxu0  ;;  %5009 = vst [vmem:[#allocation25_spill] sm:$0xff] %v4518_v17 }
 0x1db   : > { %v4464_v49 = vpop.f32.mrf.mxu0  ;;  %v4522_v51 = vpop.permute.xlu1 %1788 }
 0x1dc   : > { %v1784_v21 = vpop.permute.xlu0 %1783 }
 0x1dd   : > { %v4468_v54 = vpop.f32.mrf.mxu0 }
 0x1df   : > { %v4472_v31 = vpop.f32.mrf.mxu0  ;;  %v4526_v24 = vpop.permute.xlu1 %1610 }
 0x1e0   : > { %v1606_v22 = vpop.permute.xlu0 %1605 }
 0x1e1   : > { %v4478_v60 = vpop.f32.mrf.mxu0 }
 0x1e3   : > { %v4482_v62 = vpop.f32.mrf.mxu0  ;;  %v4532_v27 = vpop.permute.xlu1 %1956 }
 0x1e4   : > { %v1952_v40 = vpop.permute.xlu0 %1951 }
 0x1e5   : > { %v4486_v0 = vpop.f32.mrf.mxu0 }
 0x1e7   : > { %v4492_v57 = vpop.f32.mrf.mxu0  ;;  %v4536_v35 = vpop.permute.xlu1 %1778 }
 0x1e8   : > { %v1774_v29 = vpop.permute.xlu0 %1773 }
 0x1e9   : > { %v4496_v4 = vpop.f32.mrf.mxu0 }
 0x1eb   : > { %v4500_v52 = vpop.f32.mrf.mxu0 }
 0x1ed   : > { %v4506_v19 = vpop.f32.mrf.mxu0 }
 0x1ef   : > { %v4510_v20 = vpop.f32.mrf.mxu0 }
 0x1f1   : > { %v4512_v12 = vpop.f32.mrf.mxu0 }
 0x1f2   : > { %5006 = vst [vmem:[#allocation22_spill] sm:$0xff] %v4512_v12 }
 0x1f3   : > { %v4516_v16 = vpop.f32.mrf.mxu0 }
 0x1f4   : > { %5008 = vst [vmem:[#allocation24_spill] sm:$0xff] %v4516_v16 }
 0x1f5   : > { %v4520_v18 = vpop.f32.mrf.mxu0 }
 0x1f6   : > { %5010 = vst [vmem:[#allocation26_spill] sm:$0xff] %v4520_v18 }
 0x1f7   : > { %v4524_v56 = vpop.f32.mrf.mxu0 }
 0x1f8   : > { %5011 = vst [vmem:[#allocation27_spill] sm:$0xff] %v4524_v56  ;;  %v4542_v56 = vpop.permute.xlu1 %1720 }
 0x1f9   : > { %v4528_v25 = vpop.f32.mrf.mxu0  ;;  %5017 = vst [vmem:[#allocation33_spill] sm:$0xff] %v4542_v56 }
 0x1fa   : > { %5012 = vst [vmem:[#allocation28_spill] sm:$0xff] %v4528_v25  ;;  %v4546_v25 = vpop.permute.xlu0 %1715 }
 0x1fb   : > { %v4530_v26 = vpop.f32.mrf.mxu0  ;;  %5019 = vst [vmem:[#allocation35_spill] sm:$0xff] %v4546_v25 }
 0x1fc   : > { %5013 = vst [vmem:[#allocation29_spill] sm:$0xff] %v4530_v26  ;;  %v4548_v15 = vpop.permute.xlu1 %1946 }
 0x1fd   : > { %v4534_v2 = vpop.f32.mrf.mxu0  ;;  %5020 = vst [vmem:[#allocation36_spill] sm:$0xff] %v4548_v15 }
 0x1fe   : > { %5014 = vst [vmem:[#allocation30_spill] sm:$0xff] %v4534_v2  ;;  %v1942_v11 = vpop.permute.xlu0 %1941 }
 0x1ff   : > { %v4538_v18 = vpop.f32.mrf.mxu0 }
 0x200   : > { %5015 = vst [vmem:[#allocation31_spill] sm:$0xff] %v4538_v18 }
 0x201   : > { %v4540_v33 = vpop.f32.mrf.mxu0 }
 0x202   : > { %5016 = vst [vmem:[#allocation32_spill] sm:$0xff] %v4540_v33  ;;  %v4550_v33 = vpop.permute.xlu1 %1888  ;;  %v4555_v48 = vpop.permute.xlu0 %1883 }
 0x203   : > { %v4544_v10 = vpop.f32.mrf.mxu0  ;;  %5021 = vst [vmem:[#allocation37_spill] sm:$0xff] %v4550_v33  ;;  %5022 = vst [vmem:[#allocation38_spill] sm:$0xff] %v4555_v48 }
 0x204   : > { %5018 = vst [vmem:[#allocation34_spill] sm:$0xff] %v4544_v10 }
 0x206   : > { %v4557_v17 = vpop.permute.xlu1 %1710 }
 0x24b   : > { %v3061_v16 = vpop.f32.mrf.mxu1  ;;  %v3101_v26 = vpop.f32.mrf.mxu0 }
 0x24c   : > { %v1183_v23 = vadd.f32 %v3061_v16, %v3021_v9 }
 0x24d   : > { %v1174_v2 = vpop.f32.mrf.mxu1  ;;  %v1460_v41 = vpop.f32.mrf.mxu0 }
 0x24e   : > { %v1557_v18 = vadd.f32 %v3101_v26, %v1183_v23  ;;  %v1175_v56 = vadd.f32 %v1174_v2, %v4454_v45 }
 0x24f   : > { %v3062_v34 = vpop.f32.mrf.mxu1  ;;  %v3102_v36 = vpop.f32.mrf.mxu0 }
 0x250   : > { %v1186_v10 = vadd.f32 %v3062_v34, %v4458_v46  ;;  %v1725_v32 = vadd.f32 %v1616_v13, %v1557_v18  ;;  %v1555_v44 = vadd.f32 %v1460_v41, %v1175_v56 }
 0x251   : > { %v1177_v59 = vpop.f32.mrf.mxu1  ;;  %v1463_v6 = vpop.f32.mrf.mxu0 }
 0x252   : > { %v1558_v15 = vadd.f32 %v3102_v36, %v1186_v10  ;;  %v1893_v33 = vmul.f32 %v1784_v21, %v1725_v32  ;;  %v1723_v13 = vadd.f32 %v1606_v22, %v1555_v44  ;;  %v4562_v10 = vpop.permute.xlu0 %1705  ;;  %v4571_v44 = vpop.permute.xlu1 %2056 }
 0x253   : > { %v3065_v25 = vpop.f32.mrf.mxu1  ;;  %v3105_v12 = vpop.f32.mrf.mxu0 }
 0x254   : > { %v1199_v28 = vadd.f32 %v3065_v25, %v4468_v54  ;;  %v1726_v54 = vadd.f32 %v1621_v8, %v1558_v15  ;;  %v4566_v32 = vadd.f32 %v1952_v40, %v1893_v33  ;;  %v1891_v8 = vmul.f32 %v1774_v29, %v1723_v13 }
 0x255   : > { %v1190_v9 = vpop.f32.mrf.mxu1  ;;  %v1476_v16 = vpop.f32.mrf.mxu0 }
 0x256   : > { %v1561_v23 = vadd.f32 %v3105_v12, %v1199_v28  ;;  %v1178_v28 = vadd.f32 %v1177_v59, %v4464_v49  ;;  %v1191_v36 = vadd.f32 %v1190_v9, %v4472_v31  ;;  %v4579_v9 = vpop.permute.xlu0 %2051  ;;  %v4581_v29 = vadd.f32 %v1942_v11, %v1891_v8 }
 0x257   : > { %v3066_v26 = vpop.f32.mrf.mxu1  ;;  %v3106_v3 = vpop.f32.mrf.mxu0 }
 0x258   : > { %v1729_v2 = vadd.f32 %v4474_v55, %v1561_v23  ;;  %v1202_v34 = vadd.f32 %v3066_v26, %v4478_v60  ;;  %v1556_v59 = vadd.f32 %v1463_v6, %v1178_v28  ;;  %v1559_v31 = vadd.f32 %v1476_v16, %v1191_v36  ;;  %5023 = vst [vmem:[#allocation39_spill] sm:$0xff] %v4581_v29 }
 0x259   : > { %v1193_v45 = vpop.f32.mrf.mxu1  ;;  %v1479_v46 = vpop.f32.mrf.mxu0 }
 0x25a   : > { %v1897_v18 = vmul.f32 %v4488_v1, %v1729_v2  ;;  %v1562_v25 = vadd.f32 %v3106_v3, %v1202_v34  ;;  %v1894_v3 = vmul.f32 %v4522_v51, %v1726_v54  ;;  %v1724_v26 = vadd.f32 %v4526_v24, %v1556_v59  ;;  %v4595_v34 = vpop.permute.xlu1 %1878  ;;  %v4609_v8 = vpop.permute.xlu0 %1873 }
 0x25b   : > { %v3069_v48 = vpop.f32.mrf.mxu1  ;;  %v3109_v41 = vpop.f32.mrf.mxu0  ;;  %v1727_v2 = vadd.f32 %v4494_v58, %v1559_v31 }
 0x25c   : > { %v4569_v55 = vadd.f32 %v4502_v53, %v1897_v18  ;;  %v1730_v1 = vadd.f32 %v4470_v30, %v1562_v25  ;;  %v1215_v40 = vadd.f32 %v3069_v48, %v4486_v0  ;;  %v2109_v53 = vand.u32 2147483647, %v4566_v32 }
 0x25d   : > { %v1206_v60 = vpop.f32.mrf.mxu1  ;;  %v1492_v12 = vpop.f32.mrf.mxu0  ;;  %v4588_v6 = vadd.f32 %v4532_v27, %v1894_v3 }
 0x25e   : > { %v2113_v15 = vand.u32 2147483647, %v4569_v55  ;;  %v1898_v33 = vmul.f32 %v4484_v63, %v1730_v1  ;;  %v1565_v51 = vadd.f32 %v3109_v41, %v1215_v40  ;;  %v1207_v23 = vadd.f32 %v1206_v60, %v4492_v57  ;;  %v5025_v40 = vld [vmem:[#allocation20_spill] sm:$0xff] }
 0x25f   : > { %v3070_v56 = vpop.f32.mrf.mxu1  ;;  %v3110_v49 = vpop.f32.mrf.mxu0  ;;  %v1194_v57 = vadd.f32 %v1193_v45, %v4482_v62  ;;  %v2133_v54 = vsub.f32 0.0, %v2109_v53  ;;  %v2110_v58 = vand.u32 2147483647, %v4588_v6  ;;  %v1895_v62 = vmul.f32 %v4508_v7, %v1727_v2 }
 0x260   : > { %v2137_v21 = vsub.f32 0.0, %v2113_v15  ;;  %v4584_v30 = vadd.f32 %v4498_v5, %v1898_v33  ;;  %v1218_v48 = vadd.f32 %v3070_v56, %v4496_v4  ;;  %v1733_v5 = vadd.f32 %v4440_v39, %v1565_v51  ;;  %v4615_v15 = vpop.permute.xlu1 %1700  ;;  %v5024_v33 = vld [vmem:[#allocation25_spill] sm:$0xff] }
 0x261   : > { %v1209_v22 = vpop.f32.mrf.mxu1  ;;  %v1495_v0 = vpop.f32.mrf.mxu0  ;;  %v1563_v27 = vadd.f32 %v1492_v12, %v1207_v23  ;;  %v2107_v4 = vand.u32 2147483647, %v4581_v29 }
 0x262   : > { %v2167_v63 = vmul.f32 1.442695, %v2137_v21  ;;  %v2114_v11 = vand.u32 2147483647, %v4584_v30  ;;  %v1566_v13 = vadd.f32 %v3110_v49, %v1218_v48  ;;  %v1901_v25 = vmul.f32 %v4448_v43, %v1733_v5  ;;  %v5030_v5 = vld [vmem:[#allocation10_spill] sm:$0xff] }
 0x263   : > { %v3073_v16 = vpop.f32.mrf.mxu1  ;;  %v1731_v41 = vadd.f32 %v4452_v14, %v1563_v27  ;;  %v1210_v28 = vadd.f32 %v1209_v22, %v4500_v52  ;;  %v3113_v36 = vpop.f32.mrf.mxu0  ;;  %v1560_v43 = vadd.f32 %v1479_v46, %v1194_v57  ;;  %v1892_v52 = vmul.f32 %v4536_v35, %v1724_v26  ;;  %v5026_v22 = vld [vmem:[#allocation36_spill] sm:$0xff]  ;;  %v5029_v26 = vld [vmem:[#allocation6_spill] sm:$0xff] }
 0x264   : > { %3429 = vpow2.f32 %v2167_v63  ;;  %v2138_v18 = vsub.f32 0.0, %v2114_v11  ;;  %v1734_v39 = vadd.f32 %v4438_v37, %v1566_v13  ;;  %v4606_v60 = vadd.f32 %v4460_v47, %v1901_v25  ;;  %v5031_v27 = vld [vmem:[#allocation22_spill] sm:$0xff]  ;;  %v5032_v25 = vld [vmem:[#allocation21_spill] sm:$0xff] }
 0x265   : > { %v1222_v24 = vpop.f32.mrf.mxu1  ;;  %v1231_v12 = vadd.f32 %v3073_v16, %v4506_v19  ;;  %v1899_v1 = vmul.f32 %v4466_v50, %v1731_v41  ;;  %v1564_v3 = vadd.f32 %v1495_v0, %v1210_v28  ;;  %v2131_v37 = vsub.f32 0.0, %v2107_v4  ;;  %v1508_v56 = vpop.f32.mrf.mxu0  ;;  %v5028_v0 = vld [vmem:[#allocation18_spill] sm:$0xff]  ;;  %v5033_v41 = vld [vmem:[#allocation19_spill] sm:$0xff] }
 0x266   : > { %v2169_v45 = vmul.f32 1.442695, %v2138_v18  ;;  %v1223_v14 = vadd.f32 %v1222_v24, %v4510_v20  ;;  %v1902_v7 = vmul.f32 %v4446_v42, %v1734_v39  ;;  %v2117_v47 = vand.u32 2147483647, %v4606_v60  ;;  %v4639_v4 = vpop.permute.xlu1 %2046 }
 0x267   : > { %v4619_v19 = vadd.f32 %v4480_v61, %v1899_v1  ;;  %v1732_v46 = vadd.f32 %v4450_v38, %v1564_v3  ;;  %v2159_v50 = vmul.f32 1.442695, %v2133_v54  ;;  %v2134_v49 = vsub.f32 0.0, %v2110_v58  ;;  %v3074_v31 = vpop.f32.mrf.mxu1  ;;  %v5027_v61 = vld [vmem:[#allocation17_spill] sm:$0xff]  ;;  %v4633_v38 = vpop.permute.xlu0 %1695 }
 0x268   : > { %3431 = vpow2.f32 %v2169_v45  ;;  %v1569_v59 = vadd.f32 %v3113_v36, %v1231_v12  ;;  %v1567_v20 = vadd.f32 %v1508_v56, %v1223_v14  ;;  %v4623_v35 = vadd.f32 %v5024_v33, %v1895_v62  ;;  %v3114_v28 = vpop.f32.mrf.mxu0  ;;  %v5034_v45 = vld [vmem:[#allocation8_spill] sm:$0xff] }
 0x269   : > { %v1728_v42 = vadd.f32 %v5025_v40, %v1560_v43  ;;  %v2115_v53 = vand.u32 2147483647, %v4619_v19  ;;  %v2155_v21 = vmul.f32 1.442695, %v2131_v37  ;;  %v4628_v51 = vadd.f32 %v5026_v22, %v1892_v52  ;;  %v1225_v54 = vpop.f32.mrf.mxu1  ;;  %v5035_v43 = vld [vmem:[#allocation14_spill] sm:$0xff] }
 0x26a   : > { %v4631_v23 = vadd.f32 %v5027_v61, %v1902_v7  ;;  %v2141_v63 = vsub.f32 0.0, %v2117_v47  ;;  %v1900_v16 = vmul.f32 %v5028_v0, %v1732_v46  ;;  %v1737_v2 = vadd.f32 %v5029_v26, %v1569_v59  ;;  %v5036_v7 = vld [vmem:[#allocation12_spill] sm:$0xff]  ;;  %v4665_v0 = vpop.permute.xlu1 %1868 }
 0x26b   : > { %v2139_v48 = vsub.f32 0.0, %v2115_v53  ;;  %3433 = vpow2.f32 %v2159_v50  ;;  %v2161_v11 = vmul.f32 1.442695, %v2134_v49  ;;  %v1735_v57 = vadd.f32 %v5030_v5, %v1567_v20  ;;  %v5037_v46 = vld [vmem:[#allocation16_spill] sm:$0xff]  ;;  %v5038_v50 = vld [vmem:[#allocation5_spill] sm:$0xff]  ;;  %v3077_v59 = vpop.f32.mrf.mxu1  ;;  %v4657_v20 = vpop.permute.xlu0 %2041  ;;  %v5041_v5 = vld [vmem:[#allocation7_spill] sm:$0xff] }
 0x26c   : > { %v1234_v13 = vadd.f32 %v3074_v31, %v5031_v27  ;;  %v2111_v18 = vand.u32 2147483647, %v4623_v35  ;;  %v1896_v24 = vmul.f32 %v5032_v25, %v1728_v42  ;;  %v4644_v39 = vadd.f32 %v5033_v41, %v1900_v16  ;;  %v5039_v31 = vld [vmem:[#allocation23_spill] sm:$0xff]  ;;  %v5040_v42 = vld [vmem:[#allocation24_spill] sm:$0xff] }
 0x26d   : > { %v2171_v58 = vmul.f32 1.442695, %v2139_v48  ;;  %v2118_v62 = vand.u32 2147483647, %v4631_v23  ;;  %v1905_v12 = vmul.f32 %v5034_v45, %v1737_v2  ;;  %v1903_v1 = vmul.f32 %v5035_v43, %v1735_v57  ;;  %v5042_v41 = vld [vmem:[#allocation11_spill] sm:$0xff] }
 0x26e   : > { %v1570_v3 = vadd.f32 %v3114_v28, %v1234_v13  ;;  %3435 = vpow2.f32 %v2155_v21  ;;  %v2175_v37 = vmul.f32 1.442695, %v2141_v63  ;;  %v2116_v52 = vand.u32 2147483647, %v4644_v39  ;;  %v1511_v63 = vpop.f32.mrf.mxu0 }
 0x26f   : > { %3437 = vpow2.f32 %v2171_v58  ;;  %v4651_v47 = vadd.f32 %v5036_v7, %v1905_v12  ;;  %v4654_v56 = vadd.f32 %v5037_v46, %v1903_v1  ;;  %v4660_v33 = vadd.f32 %v5039_v31, %v1896_v24  ;;  %v4674_v12 = vpop.permute.xlu0 %1863 }
 0x270   : > { %v1738_v49 = vadd.f32 %v5038_v50, %v1570_v3  ;;  %v2140_v40 = vsub.f32 0.0, %v2116_v52  ;;  %v1226_v53 = vadd.f32 %v1225_v54, %v5040_v42  ;;  %v2108_v21 = vand.u32 2147483647, %v4628_v51  ;;  %v3117_v25 = vpop.f32.mrf.mxu0  ;;  %v4678_v50 = vpop.permute.xlu1 %1690  ;;  %v5045_v42 = vld [vmem:[#allocation15_spill] sm:$0xff] }
 0x271   : > { %v3430_v36 = vpop.eup %3429  ;;  %v2142_v22 = vsub.f32 0.0, %v2118_v62  ;;  %v2121_v61 = vand.u32 2147483647, %v4651_v47  ;;  %v2135_v16 = vsub.f32 0.0, %v2111_v18  ;;  %v2119_v2 = vand.u32 2147483647, %v4654_v56 }
 0x272   : > { %v2209_v14 = vadd.f32 1.0, %v3430_v36  ;;  %v2173_v26 = vmul.f32 1.442695, %v2140_v40  ;;  %v1906_v57 = vmul.f32 %v5041_v5, %v1738_v49  ;;  %v1568_v54 = vadd.f32 %v1511_v63, %v1226_v53  ;;  %v5043_v62 = vld [vmem:[#allocation9_spill] sm:$0xff]  ;;  %v1524_v7 = vpop.f32.mrf.mxu0 }
 0x273   : > { %v2145_v13 = vsub.f32 0.0, %v2121_v61  ;;  %v2112_v24 = vand.u32 2147483647, %v4660_v33  ;;  %v2143_v58 = vsub.f32 0.0, %v2119_v2  ;;  %v2177_v18 = vmul.f32 1.442695, %v2142_v22 }
 0x274   : > { %3439 = vlog2.f32 %v2209_v14  ;;  %v4671_v28 = vadd.f32 %v5042_v41, %v1906_v57  ;;  %v1736_v45 = vadd.f32 %v5043_v62, %v1568_v54  ;;  %v2163_v3 = vmul.f32 1.442695, %v2135_v16  ;;  %v5044_v14 = vld [vmem:[#allocation13_spill] sm:$0xff]  ;;  %v5046_v61 = vld [vmem:[#allocation26_spill] sm:$0xff]  ;;  %v3118_v2 = vpop.f32.mrf.mxu0  ;;  %v1686_v57 = vpop.permute.xlu0 %1685 }
 0x275   : > { %3441 = vpow2.f32 %v2161_v11  ;;  %v3432_v48 = vpop.eup %3431  ;;  %v1238_v11 = vpop.f32.mrf.mxu1  ;;  %v2183_v36 = vmul.f32 1.442695, %v2145_v13  ;;  %v2179_v43 = vmul.f32 1.442695, %v2143_v58  ;;  %v2132_v49 = vsub.f32 0.0, %v2108_v21  ;;  %v5047_v58 = vld [vmem:[#allocation28_spill] sm:$0xff] }
 0x276   : > { %v2210_v27 = vadd.f32 1.0, %v3432_v48  ;;  %3443 = vpow2.f32 %v2175_v37  ;;  %v2122_v1 = vand.u32 2147483647, %v4671_v28  ;;  %v1904_v37 = vmul.f32 %v5044_v14, %v1736_v45 }
 0x277   : > { %3445 = vpow2.f32 %v2173_v26  ;;  %v3078_v52 = vpop.f32.mrf.mxu1  ;;  %v2136_v40 = vsub.f32 0.0, %v2112_v24  ;;  %v1247_v63 = vadd.f32 %v3077_v59, %v5046_v61 }
 0x278   : > { %3447 = vlog2.f32 %v2210_v27  ;;  %v3434_v46 = vpop.eup %3433  ;;  %v2146_v31 = vsub.f32 0.0, %v2122_v1  ;;  %v4681_v53 = vadd.f32 %v5045_v42, %v1904_v37  ;;  %v2157_v27 = vmul.f32 1.442695, %v2132_v49  ;;  %v5048_v1 = vld [vmem:[#allocation27_spill] sm:$0xff]  ;;  %v1527_v37 = vpop.f32.mrf.mxu0 }
 0x279   : > { %3449 = vpow2.f32 %v2183_v36  ;;  %v1241_v26 = vpop.f32.mrf.mxu1  ;;  %v2165_v13 = vmul.f32 1.442695, %v2136_v40  ;;  %v1250_v41 = vadd.f32 %v3078_v52, %v5047_v58  ;;  %v2037_v36 = vpop.permute.xlu1 %2036  ;;  %v2205_v62 = vadd.f32 1.0, %v3434_v46  ;;  %v5049_v40 = vld [vmem:[#allocation29_spill] sm:$0xff] }
 0x27a   : > { %3451 = vpow2.f32 %v2177_v18  ;;  %v2185_v22 = vmul.f32 1.442695, %v2146_v31  ;;  %v2120_v16 = vand.u32 2147483647, %v4681_v53  ;;  %v1573_v59 = vadd.f32 %v3117_v25, %v1247_v63  ;;  %v3121_v58 = vpop.f32.mrf.mxu0 }
 0x27b   : > { %3453 = vpow2.f32 %v2179_v43  ;;  %v3436_v48 = vpop.eup %3435  ;;  %v3081_v14 = vpop.f32.mrf.mxu1  ;;  %v2089_v49 = vmax.f32 %v4569_v55, 0.0  ;;  %v1242_v42 = vadd.f32 %v1241_v26, %v5049_v40  ;;  %v2090_v52 = vmax.f32 %v4584_v30, 0.0 }
 0x27c   : > { %3455 = vpow2.f32 %v2163_v3  ;;  %v3438_v5 = vpop.eup %3437  ;;  %v2144_v24 = vsub.f32 0.0, %v2120_v16  ;;  %v1239_v3 = vadd.f32 %v1238_v11, %v5048_v1  ;;  %v1574_v46 = vadd.f32 %v3118_v2, %v1250_v41 }
 0x27d   : > { %v2211_v54 = vadd.f32 1.0, %v3438_v5  ;;  %3457 = vpow2.f32 %v2185_v22  ;;  %v2032_v22 = vpop.permute.xlu0 %2031  ;;  %v1741_v11 = vadd.f32 %v4633_v38, %v1573_v59  ;;  %v2203_v1 = vadd.f32 1.0, %v3436_v48  ;;  %v1859_v41 = vpop.permute.xlu1 %1858  ;;  %v5051_v59 = vld [vmem:[#allocation31_spill] sm:$0xff] }
 0x27e   : > { %v2181_v43 = vmul.f32 1.442695, %v2144_v24  ;;  %v1254_v24 = vpop.f32.mrf.mxu1  ;;  %v1572_v2 = vadd.f32 %v1527_v37, %v1242_v42 }
 0x27f   : > { %3459 = vlog2.f32 %v2211_v54  ;;  %v1909_v38 = vmul.f32 %v4674_v12, %v1741_v11  ;;  %v5052_v12 = vld [vmem:[#allocation35_spill] sm:$0xff]  ;;  %v2091_v11 = vmax.f32 %v4619_v19, 0.0 }
 0x280   : > { %3461 = vpow2.f32 %v2157_v27  ;;  %v5050_v27 = vld [vmem:[#allocation30_spill] sm:$0xff] }
 0x281   : > { %v3440_v21 = vpop.eup %3439  ;;  %3463 = vpow2.f32 %v2165_v13  ;;  %v1263_v54 = vadd.f32 %v3081_v14, %v5050_v27  ;;  %v1742_v13 = vadd.f32 %v4615_v15, %v1574_v46  ;;  %v1540_v14 = vpop.f32.mrf.mxu0 }
 0x282   : > { %v3442_v18 = vpop.eup %3441  ;;  %v2240_v45 = vmul.f32 0.6931472, %v3440_v21  ;;  %3465 = vlog2.f32 %v2205_v62  ;;  %v1571_v21 = vadd.f32 %v1524_v7, %v1239_v3  ;;  %v1854_v42 = vpop.permute.xlu0 %1853 }
 0x283   : > { %v3444_v31 = vpop.eup %3443  ;;  %3467 = vpow2.f32 %v2181_v43  ;;  %v2206_v40 = vadd.f32 1.0, %v3442_v18  ;;  %v1910_v7 = vmul.f32 %v4665_v0, %v1742_v13  ;;  %v1255_v43 = vadd.f32 %v1254_v24, %v5051_v59  ;;  %v5053_v24 = vld [vmem:[#allocation38_spill] sm:$0xff]  ;;  %v5054_v13 = vld [vmem:[#allocation32_spill] sm:$0xff] }
 0x284   : > { %v3446_v61 = vpop.eup %3445  ;;  %v2281_v25 = vadd.f32 %v2240_v45, %v2089_v49  ;;  %v2213_v62 = vadd.f32 1.0, %v3444_v31  ;;  %v1739_v48 = vadd.f32 %v1686_v57, %v1571_v21  ;;  %v1740_v18 = vadd.f32 %v4678_v50, %v1572_v2  ;;  %v2027_v50 = vpop.permute.xlu1 %2026 }
 0x285   : > { %v3448_v16 = vpop.eup %3447  ;;  %v2212_v63 = vadd.f32 1.0, %v3446_v61  ;;  %v1577_v15 = vadd.f32 %v3121_v58, %v1263_v54  ;;  %v3082_v61 = vpop.f32.mrf.mxu1  ;;  %v4698_v0 = vadd.f32 %v2032_v22, %v1909_v38 }
 0x286   : > { %v2242_v5 = vmul.f32 0.6931472, %v3448_v16  ;;  %v3450_v26 = vpop.eup %3449  ;;  %v1908_v46 = vmul.f32 %v1859_v41, %v1740_v18  ;;  %v3122_v22 = vpop.f32.mrf.mxu0  ;;  %v1266_v2 = vadd.f32 %v3082_v61, %v5054_v13  ;;  %v5057_v13 = vld [vmem:[#allocation37_spill] sm:$0xff] }
 0x287   : > { %3469 = vlog2.f32 %v2212_v63  ;;  %v2217_v45 = vadd.f32 1.0, %v3450_v26  ;;  %v3452_v49 = vpop.eup %3451  ;;  %v1745_v16 = vadd.f32 %v5052_v12, %v1577_v15  ;;  %v1257_v26 = vpop.f32.mrf.mxu1 }
 0x288   : > { %v2282_v29 = vadd.f32 %v2242_v5, %v2090_v52  ;;  %3471 = vtanh.f32 %v2281_v25  ;;  %v3454_v3 = vpop.eup %3453  ;;  %v2214_v52 = vadd.f32 1.0, %v3452_v49  ;;  %v4700_v25 = vadd.f32 %v2037_v36, %v1910_v7 }
 0x289   : > { %v3456_v37 = vpop.eup %3455  ;;  %v2215_v31 = vadd.f32 1.0, %v3454_v3  ;;  %v1907_v5 = vmul.f32 %v1854_v42, %v1739_v48  ;;  %v4703_v54 = vadd.f32 %v2027_v50, %v1908_v46  ;;  %v1913_v58 = vmul.f32 %v5053_v24, %v1745_v16  ;;  %v5055_v48 = vld [vmem:[#allocation34_spill] sm:$0xff]  ;;  %v1543_v42 = vpop.f32.mrf.mxu0 }
 0x28a   : > { %3473 = vtanh.f32 %v2282_v29  ;;  %v1575_v29 = vadd.f32 %v1540_v14, %v1255_v43  ;;  %v3458_v57 = vpop.eup %3457  ;;  %v2207_v63 = vadd.f32 1.0, %v3456_v37  ;;  %v2126_v49 = vand.u32 2147483647, %v4700_v25 }
 0x28b   : > { %3475 = vlog2.f32 %v2217_v45  ;;  %v2218_v27 = vadd.f32 1.0, %v3458_v57  ;;  %v2125_v45 = vand.u32 2147483647, %v4698_v0  ;;  %v4713_v38 = vadd.f32 %v4579_v9, %v1913_v58 }
 0x28c   : > { %3477 = vlog2.f32 %v2203_v1  ;;  %v3460_v21 = vpop.eup %3459  ;;  %v1743_v7 = vadd.f32 %v4562_v10, %v1575_v29  ;;  %v2097_v43 = vmax.f32 %v4651_v47, 0.0  ;;  %v1258_v18 = vadd.f32 %v1257_v26, %v5055_v48 }
 0x28d   : > { %3479 = vlog2.f32 %v2206_v40  ;;  %v4706_v1 = vpop.eup %3461  ;;  %v2244_v36 = vmul.f32 0.6931472, %v3460_v21  ;;  %v2092_v40 = vmax.f32 %v4644_v39, 0.0  ;;  %v2124_v14 = vand.u32 2147483647, %v4703_v54  ;;  %v5056_v21 = vld [vmem:[#allocation33_spill] sm:$0xff] }
 0x28e   : > { %3481 = vlog2.f32 %v2213_v62  ;;  %v3464_v41 = vpop.eup %3463  ;;  %v2022_v62 = vpop.permute.xlu0 %2021  ;;  %v2129_v37 = vand.u32 2147483647, %v4713_v38  ;;  %v1911_v9 = vmul.f32 %v4609_v8, %v1743_v7  ;;  %v2149_v12 = vsub.f32 0.0, %v2125_v45 }
 0x28f   : > { %3483 = vlog2.f32 %v2215_v31  ;;  %v4716_v59 = vpop.eup %3465  ;;  %v4719_v3 = vadd.f32 %v2022_v62, %v1907_v5  ;;  %v2208_v31 = vadd.f32 1.0, %v3464_v41  ;;  %v2283_v10 = vadd.f32 %v2244_v36, %v2091_v11 }
 0x290   : > { %3485 = vlog2.f32 %v2214_v52  ;;  %v3468_v15 = vpop.eup %3467  ;;  %v1578_v52 = vadd.f32 %v3122_v22, %v1266_v2  ;;  %v2150_v16 = vsub.f32 0.0, %v2126_v49  ;;  %v2153_v29 = vsub.f32 0.0, %v2129_v37 }
 0x291   : > { %3487 = vlog2.f32 %v2218_v27  ;;  %v2216_v61 = vadd.f32 1.0, %v3468_v15  ;;  %v4726_v57 = vadd.f32 %v4657_v20, %v1911_v9  ;;  %v2123_v5 = vand.u32 2147483647, %v4719_v3 }
 0x292   : > { %3489 = vlog2.f32 %v2207_v63  ;;  %v1746_v27 = vadd.f32 %v5056_v21, %v1578_v52  ;;  %v1576_v24 = vadd.f32 %v1543_v42, %v1258_v18  ;;  %v2148_v58 = vsub.f32 0.0, %v2124_v14 }
 0x293   : > { %3491 = vlog2.f32 %v2216_v61  ;;  %v2199_v11 = vmul.f32 1.442695, %v2153_v29  ;;  %v2127_v26 = vand.u32 2147483647, %v4726_v57  ;;  %v2193_v45 = vmul.f32 1.442695, %v2150_v16 }
 0x294   : > { %v3470_v46 = vpop.eup %3469  ;;  %3493 = vtanh.f32 %v2283_v10  ;;  %v1914_v2 = vmul.f32 %v5057_v13, %v1746_v27  ;;  %v1744_v20 = vadd.f32 %v4557_v17, %v1576_v24  ;;  %v2191_v48 = vmul.f32 1.442695, %v2149_v12 }
 0x295   : > { %v3472_v50 = vpop.eup %3471  ;;  %v2246_v63 = vmul.f32 0.6931472, %v3470_v46  ;;  %3495 = vpow2.f32 %v2199_v11  ;;  %v2151_v49 = vsub.f32 0.0, %v2127_v26  ;;  %v2147_v14 = vsub.f32 0.0, %v2123_v5 }
 0x296   : > { %v4738_v18 = vadd.f32 %v4571_v44, %v1914_v2  ;;  %v1912_v15 = vmul.f32 %v4595_v34, %v1744_v20  ;;  %v2329_v17 = vmul.f32 %v3472_v50, %v4569_v55  ;;  %v2189_v10 = vmul.f32 1.442695, %v2148_v58  ;;  %v3311_v55 = vld [vmem:[%s4974_s7 + $0x4] ss:$8 sps:$4 sm:$0xff]  }
 0x297   : > { %v3474_v8 = vpop.eup %3473  ;;  %v2284_v36 = vadd.f32 %v2246_v63, %v2092_v40  ;;  %v2195_v37 = vmul.f32 1.442695, %v2151_v49  ;;  %v2098_v34 = vmax.f32 %v4671_v28, 0.0  ;;  %v2187_v29 = vmul.f32 1.442695, %v2147_v14  ;;  %2928 = vmatprep.mubr.msk.bf16.mxu0 %vm2543_vm4, %v3311_v55 }
 0x298   : > { %v3476_v22 = vpop.eup %3475  ;;  %v2330_v9 = vmul.f32 %v3474_v8, %v4584_v30  ;;  %v2130_v61 = vand.u32 2147483647, %v4738_v18  ;;  %v4745_v44 = vadd.f32 %v4639_v4, %v1912_v15  ;;  %v3314_v30 = vld [vmem:[%s4974_s7 + $0x14] ss:$8 sps:$4 sm:$0xff]   ;;  %v2204_v27 = vadd.f32 1.0, %v4706_v1 }
 0x299   : > { %v4733_v41 = vpop.eup %3477  ;;  %v2256_v62 = vmul.f32 0.6931472, %v3476_v22  ;;  %3497 = vtanh.f32 %v2284_v36  ;;  %v2095_v24 = vmax.f32 %v4654_v56, 0.0  ;;  %v2094_v11 = vmax.f32 %v4631_v23, 0.0  ;;  %2929 = vmatprep.mubr.msk.bf16.mxu1 %vm2543_vm4, %v3314_v30 }
 0x29a   : > { %v4735_v7 = vpop.eup %3479  ;;  %3499 = vlog2.f32 %v2208_v31  ;;  %v4747_v12 = vpack.c.bf16 %v2330_v9, %v2329_v17  ;;  %v2154_v16 = vsub.f32 0.0, %v2130_v61  ;;  %v2128_v4 = vand.u32 2147483647, %v4745_v44 }
 0x29b   : > { %v3482_v40 = vpop.eup %3481  ;;  %v2289_v46 = vadd.f32 %v2256_v62, %v2097_v43  ;;  %3501 = vpow2.f32 %v2193_v45  ;;  %v2093_v2 = vmax.f32 %v4606_v60, 0.0  ;;  %v2096_v62 = vmax.f32 %v4681_v53, 0.0 }
 0x29c   : > { %v3484_v42 = vpop.eup %3483  ;;  %3503 = vpow2.f32 %v2195_v37  ;;  %v2201_v21 = vmul.f32 1.442695, %v2154_v16  ;;  %v2152_v8 = vsub.f32 0.0, %v2128_v4  ;;  %v2248_v58 = vmul.f32 0.6931472, %v3482_v40 }
 0x29d   : > { %v3486_v52 = vpop.eup %3485  ;;  %v2252_v43 = vmul.f32 0.6931472, %v3484_v42  ;;  %3505 = vpow2.f32 %v2191_v48  ;;  %v2087_v61 = vmax.f32 %v4623_v35, 0.0 }
 0x29e   : > { %v3488_v31 = vpop.eup %3487  ;;  %v2250_v63 = vmul.f32 0.6931472, %v3486_v52  ;;  %3507 = vpow2.f32 %v2189_v10  ;;  %v2197_v36 = vmul.f32 1.442695, %v2152_v8  ;;  %v2285_v48 = vadd.f32 %v2248_v58, %v2093_v2 }
 0x29f   : > { %v3490_v50 = vpop.eup %3489  ;;  %v2258_v5 = vmul.f32 0.6931472, %v3488_v31  ;;  %3509 = vtanh.f32 %v2289_v46  ;;  %v2287_v22 = vadd.f32 %v2252_v43, %v2095_v24  ;;  %v2232_v58 = vmul.f32 0.6931472, %v4716_v59 }
 0x2a0   : > { %3511 = vpow2.f32 %v2201_v21  ;;  %v3492_v13 = vpop.eup %3491  ;;  %v2286_v20 = vadd.f32 %v2250_v63, %v2094_v11  ;;  %v2236_v37 = vmul.f32 0.6931472, %v3490_v50 }
 0x2a1   : > { %v2290_v26 = vadd.f32 %v2258_v5, %v2098_v34  ;;  %3513 = vpow2.f32 %v2187_v29  ;;  %v3494_v1 = vpop.eup %3493  ;;  %v2254_v45 = vmul.f32 0.6931472, %v3492_v13 }
 0x2a2   : > { %v3496_v49 = vpop.eup %3495  ;;  %v2331_v17 = vmul.f32 %v3494_v1, %v4619_v19  ;;  %v2279_v16 = vadd.f32 %v2236_v37, %v2087_v61  ;;  %v2088_v19 = vmax.f32 %v4660_v33, 0.0 }
 0x2a3   : > { %3515 = vtanh.f32 %v2290_v26  ;;  %v2288_v40 = vadd.f32 %v2254_v45, %v2096_v62  ;;  %v2225_v14 = vadd.f32 1.0, %v3496_v49 }
 0x2a4   : > { %3517 = vlog2.f32 %v2204_v27  ;;  %v2234_v27 = vmul.f32 0.6931472, %v4735_v7 }
 0x2a5   : > { %3519 = vpow2.f32 %v2197_v36  ;;  %v2086_v36 = vmax.f32 %v4588_v6, 0.0 }
 0x2a6   : > { %v3498_v15 = vpop.eup %3497  ;;  %3521 = vtanh.f32 %v2287_v22 }
 0x2a7   : > { %3523 = vtanh.f32 %v2286_v20  ;;  %v2332_v9 = vmul.f32 %v3498_v15, %v4644_v39  ;;  %v3500_v42 = vpop.eup %3499  ;;  %v2085_v20 = vmax.f32 %v4566_v32, 0.0  ;;  %v2278_v45 = vadd.f32 %v2234_v27, %v2086_v36 }
 0x2a8   : > { %3525 = vtanh.f32 %v2288_v40  ;;  %v3502_v10 = vpop.eup %3501  ;;  %v2238_v55 = vmul.f32 0.6931472, %v3500_v42  ;;  %v2228_v15 = vmul.f32 0.6931472, %v4733_v41  ;;  %v5058_v40 = vmov 0  }
 0x2a9   : > { %3527 = vtanh.f32 %v2285_v48  ;;  %v4767_v52 = vpack.c.bf16 %v2332_v9, %v2331_v17  ;;  %v3504_v46 = vpop.eup %3503  ;;  %v2222_v43 = vadd.f32 1.0, %v3502_v10  ;;  %v2277_v48 = vadd.f32 %v2232_v58, %v2085_v20  ;;  %v5059_v9 = vld [vmem:[#allocation39_spill] sm:$0xff] }
 0x2aa   : > { %3529 = vlog2.f32 %v2225_v14  ;;  %v3506_v34 = vpop.eup %3505  ;;  %v2223_v30 = vadd.f32 1.0, %v3504_v46  ;;  %v2280_v63 = vadd.f32 %v2238_v55, %v2088_v19  ;;  %v2083_v42 = vmax.f32 %v5059_v9, 0.0 }
 0x2ab   : > { %v3508_v31 = vpop.eup %3507  ;;  %v2221_v4 = vadd.f32 1.0, %v3506_v34  ;;  %v2101_v36 = vmax.f32 %v4698_v0, 0.0 }
 0x2ac   : > { %v3510_v29 = vpop.eup %3509  ;;  %3531 = vlog2.f32 %v2223_v30  ;;  %v2220_v24 = vadd.f32 1.0, %v3508_v31  ;;  %v2275_v34 = vadd.f32 %v2228_v15, %v2083_v42 }
 0x2ad   : > { %v3512_v39 = vpop.eup %3511  ;;  %3533 = vtanh.f32 %v2279_v16  ;;  %v2337_v11 = vmul.f32 %v3510_v29, %v4651_v47  ;;  %v2084_v47 = vmax.f32 %v4628_v51, 0.0 }
 0x2ae   : > { %v3514_v50 = vpop.eup %3513  ;;  %v2226_v5 = vadd.f32 1.0, %v3512_v39  ;;  %3535 = vlog2.f32 %v2222_v43 }
 0x2af   : > { %v2219_v13 = vadd.f32 1.0, %v3514_v50 }
 0x2b0   : > { %v3516_v21 = vpop.eup %3515  ;;  %3537 = vlog2.f32 %v2226_v5 }
 0x2b1   : > { %v3518_v8 = vpop.eup %3517  ;;  %v2338_v26 = vmul.f32 %v3516_v21, %v4671_v28  ;;  %3539 = vlog2.f32 %v2221_v4 }
 0x2b2   : > { %v3520_v22 = vpop.eup %3519  ;;  %3541 = vtanh.f32 %v2280_v63  ;;  %v2230_v49 = vmul.f32 0.6931472, %v3518_v8  ;;  %v2103_v63 = vmax.f32 %v4726_v57, 0.0  ;;  %v2102_v8 = vmax.f32 %v4700_v25, 0.0 }
 0x2b3   : > { %v3522_v2 = vpop.eup %3521  ;;  %v2224_v7 = vadd.f32 1.0, %v3520_v22  ;;  %v2370_v1 = vpack.c.bf16 %v2338_v26, %v2337_v11  ;;  %3543 = vlog2.f32 %v2220_v24  ;;  %v2104_v26 = vmax.f32 %v4745_v44, 0.0 }
 0x2b4   : > { %v3524_v62 = vpop.eup %3523  ;;  %v2335_v14 = vmul.f32 %v3522_v2, %v4654_v56  ;;  %v2276_v10 = vadd.f32 %v2230_v49, %v2084_v47 }
 0x2b5   : > { %v3526_v59 = vpop.eup %3525  ;;  %3545 = vlog2.f32 %v2224_v7  ;;  %2569 = vmatpush1.bf16.msra.mxu0 %v2370_v1  ;;  %3135 = vmatpush1.bf16.msra.mxu1 %v2370_v1  ;;  %v2334_v46 = vmul.f32 %v3524_v62, %v4631_v23  ;;  %v2100_v1 = vmax.f32 %v4703_v54, 0.0 }
 0x2b6   : > { %v3528_v28 = vpop.eup %3527  ;;  %3547 = vlog2.f32 %v2219_v13  ;;  %2570 = vmatprep.subr.bf16.mxu0 %v5058_v40  ;;  %3124 = vmatprep.subr.bf16.mxu1 %v5058_v40  ;;  %v2336_v37 = vmul.f32 %v3526_v59, %v4681_v53  ;;  %v2105_v53 = vmax.f32 %v4713_v38, 0.0 }
 0x2b7   : > { %v3530_v17 = vpop.eup %3529  ;;  %3549 = vtanh.f32 %v2278_v45  ;;  %v2333_v16 = vmul.f32 %v3528_v28, %v4606_v60  ;;  %v2106_v60 = vmax.f32 %v4738_v18, 0.0 }
 0x2b8   : > { %v2369_v61 = vpack.c.bf16 %v2336_v37, %v2335_v14  ;;  %3551 = vtanh.f32 %v2277_v48  ;;  %v2272_v41 = vmul.f32 0.6931472, %v3530_v17  ;;  %v2099_v48 = vmax.f32 %v4719_v3, 0.0 }
 0x2b9   : > { %v3532_v55 = vpop.eup %3531  ;;  %3553 = vtanh.f32 %v2276_v10  ;;  %v2368_v30 = vpack.c.bf16 %v2334_v46, %v2333_v16 }
 0x2ba   : > { %2571 = vmatpush1.bf16.msra.mxu0 %v2369_v61  ;;  %3136 = vmatpush1.bf16.msra.mxu1 %v2369_v61  ;;  %v3534_v56 = vpop.eup %3533  ;;  %3555 = vtanh.f32 %v2275_v34  ;;  %v2297_v23 = vadd.f32 %v2272_v41, %v2105_v53  ;;  %v2268_v29 = vmul.f32 0.6931472, %v3532_v55 }
 0x2bb   : > { %2572 = vmatprep.subr.bf16.mxu0 %v5058_v40  ;;  %3125 = vmatprep.subr.bf16.mxu1 %v5058_v40  ;;  %v3536_v31 = vpop.eup %3535  ;;  %v2327_v49 = vmul.f32 %v3534_v56, %v4623_v35 }
 0x2bc   : > { %v2266_v50 = vmul.f32 0.6931472, %v3536_v31  ;;  %3557 = vtanh.f32 %v2297_v23  ;;  %v2295_v58 = vadd.f32 %v2268_v29, %v2103_v63  ;;  %v3312_v23 = vld [vmem:[%s4974_s7 + $0x10] ss:$8 sps:$4 sm:$0xff]   ;;  %v3329_v63 = vld [vmem:[%s4974_s7 + $0x60] ss:$8 sps:$4 sm:$0xff]  }
 0x2bd   : > { %v3538_v43 = vpop.eup %3537  ;;  %v3320_v29 = vld [vmem:[%s4974_s7 + $0x30] ss:$8 sps:$4 sm:$0xff]  }
 0x2be   : > { %2573 = vmatpush1.bf16.msra.mxu0 %v2368_v30  ;;  %3137 = vmatpush1.bf16.msra.mxu1 %v2368_v30  ;;  %v3540_v19 = vpop.eup %3539  ;;  %v2274_v39 = vmul.f32 0.6931472, %v3538_v43  ;;  %v2294_v13 = vadd.f32 %v2266_v50, %v2102_v8  ;;  %v3327_v50 = vld [vmem:[%s4974_s7 + $0x64] ss:$8 sps:$4 sm:$0xff]  }
 0x2bf   : > { %2574 = vmatprep.subr.bf16.mxu0 %v5058_v40  ;;  %3126 = vmatprep.subr.bf16.mxu1 %v5058_v40  ;;  %v3542_v4 = vpop.eup %3541  ;;  %v2264_v24 = vmul.f32 0.6931472, %v3540_v19  ;;  %v3321_v19 = vld [vmem:[%s4974_s7 + $0x44] ss:$8 sps:$4 sm:$0xff]  }
 0x2c0   : > { %v3544_v5 = vpop.eup %3543  ;;  %v2298_v21 = vadd.f32 %v2274_v39, %v2106_v60  ;;  %v2328_v20 = vmul.f32 %v3542_v4, %v4660_v33  ;;  %v3323_v60 = vld [vmem:[%s4974_s7 + $0x40] ss:$8 sps:$4 sm:$0xff]   ;;  %v3324_v39 = vld [vmem:[%s4974_s7 + $0x54] ss:$8 sps:$4 sm:$0xff]   ;;  %v3326_v4 = vld [vmem:[%s4974_s7 + $0x50] ss:$8 sps:$4 sm:$0xff]  }
 0x2c1   : > { %v2262_v2 = vmul.f32 0.6931472, %v3544_v5  ;;  %v3330_v5 = vld [vmem:[%s4974_s7 + $0x74] ss:$8 sps:$4 sm:$0xff]  }
 0x2c2   : > { %v3546_v27 = vpop.eup %3545  ;;  %2575 = vmatpush1.bf16.msra.mxu0 %v4767_v52  ;;  %3138 = vmatpush1.bf16.msra.mxu1 %v4767_v52  ;;  %3559 = vtanh.f32 %v2298_v21  ;;  %v2293_v52 = vadd.f32 %v2264_v24, %v2101_v36  ;;  %v2365_v47 = vpack.c.bf16 %v2328_v20, %v2327_v49  ;;  %v3332_v21 = vld [vmem:[%s4974_s7 + $0x70] ss:$8 sps:$4 sm:$0xff]   ;;  %v2399_v24 = vpop.permute.xlu1 %2398  ;;  %v3573_v20 = vld [vmem:[%s3858_s29] sm:$0xff] }
 0x2c3   : > { %v3548_v11 = vpop.eup %3547  ;;  %v2270_v22 = vmul.f32 0.6931472, %v3546_v27  ;;  %2576 = vmatprep.subr.bf16.mxu0 %v5058_v40  ;;  %3127 = vmatprep.subr.bf16.mxu1 %v5058_v40  ;;  %3561 = vtanh.f32 %v2295_v58  ;;  %v2292_v33 = vadd.f32 %v2262_v2, %v2100_v1  ;;  %v2394_v27 = vpop.permute.xlu0 %2393  ;;  %v3574_v1 = vld [vmem:[%s3858_s29 + $0x10] sm:$0xff] }
 0x2c4   : > { %v3550_v7 = vpop.eup %3549  ;;  %v2260_v45 = vmul.f32 0.6931472, %v3548_v11 }
 0x2c5   : > { %v2296_v62 = vadd.f32 %v2270_v22, %v2104_v26  ;;  %v3552_v59 = vpop.eup %3551  ;;  %v2326_v28 = vmul.f32 %v3550_v7, %v4588_v6 }
 0x2c6   : > { %2577 = vmatpush1.bf16.msra.mxu0 %v4747_v12  ;;  %3139 = vmatpush1.bf16.msra.mxu1 %v4747_v12  ;;  %v3554_v15 = vpop.eup %3553  ;;  %v2291_v14 = vadd.f32 %v2260_v45, %v2099_v48  ;;  %v2325_v35 = vmul.f32 %v3552_v59, %v4566_v32  ;;  %v2409_v2 = vpop.permute.xlu1 %2408 }
 0x2c7   : > { %3563 = vtanh.f32 %v2296_v62  ;;  %2578 = vmatprep.subr.bf16.mxu0 %v5058_v40  ;;  %3128 = vmatprep.subr.bf16.mxu1 %v5058_v40  ;;  %v3556_v12 = vpop.eup %3555  ;;  %v2324_v17 = vmul.f32 %v3554_v15, %v4628_v51  ;;  %v2404_v8 = vpop.permute.xlu0 %2403  ;;  %v3576_v15 = vld [vmem:[%s3858_s29 + $0x18] sm:$0xff] }
 0x2c8   : > { %3565 = vtanh.f32 %v2294_v13  ;;  %v2364_v37 = vpack.c.bf16 %v2326_v28, %v2325_v35  ;;  %v2323_v6 = vmul.f32 %v3556_v12, %v5059_v9 }
 0x2c9   : > { %3567 = vtanh.f32 %v2293_v52  ;;  %v3558_v42 = vpop.eup %3557 }
 0x2ca   : > { %2579 = vmatpush1.bf16.msra.mxu0 %v2365_v47  ;;  %3140 = vmatpush1.bf16.msra.mxu1 %v2365_v47  ;;  %3569 = vtanh.f32 %v2292_v33  ;;  %v2363_v10 = vpack.c.bf16 %v2324_v17, %v2323_v6  ;;  %v2345_v46 = vmul.f32 %v3558_v42, %v4713_v38  ;;  %v3575_v47 = vld [vmem:[%s3858_s29 + $0x8] sm:$0xff]  ;;  %v3577_v6 = vld [vmem:[%s3858_s29 + $0x20] sm:$0xff] }
 0x2cb   : > { %2580 = vmatprep.subr.bf16.mxu0 %v5058_v40  ;;  %3129 = vmatprep.subr.bf16.mxu1 %v5058_v40  ;;  %3571 = vtanh.f32 %v2291_v14  ;;  %v2414_v35 = vpop.permute.xlu0 %2413 }
 0x2ce   : > { %2581 = vmatpush1.bf16.msra.mxu0 %v2364_v37  ;;  %3141 = vmatpush1.bf16.msra.mxu1 %v2364_v37 }
 0x2cf   : > { %2582 = vmatprep.subr.bf16.mxu0 %v5058_v40  ;;  %3130 = vmatprep.subr.bf16.mxu1 %v5058_v40  ;;  %v3560_v32 = vpop.eup %3559 }
 0x2d0   : > { %v2346_v61 = vmul.f32 %v3560_v32, %v4738_v18  ;;  %v3562_v34 = vpop.eup %3561  ;;  %v2419_v32 = vpop.permute.xlu1 %2418 }
 0x2d1   : > { %v2343_v55 = vmul.f32 %v3562_v34, %v4726_v57  ;;  %v3578_v34 = vld [vmem:[%s3858_s29 + $0x28] sm:$0xff] }
 0x2d2   : > { %2583 = vmatpush1.bf16.msra.mxu0 %v2363_v10  ;;  %3142 = vmatpush1.bf16.msra.mxu1 %v2363_v10  ;;  %v2374_v9 = vpack.c.bf16 %v2346_v61, %v2345_v46 }
 0x2d3   : > { %2592 = vmatprep.subr.bf16.mxu0 %v5058_v40  ;;  %3131 = vmatprep.subr.bf16.mxu1 %v5058_v40 }
 0x2d4   : > { %v3564_v51 = vpop.eup %3563 }
 0x2d5   : > { %v3566_v41 = vpop.eup %3565  ;;  %v2344_v16 = vmul.f32 %v3564_v51, %v4745_v44 }
 0x2d6   : > { %2593 = vmatpush2.bf16.msra.mxu0 %v2374_v9  ;;  %3143 = vmatpush2.bf16.msra.mxu1 %v2374_v9  ;;  %v3568_v56 = vpop.eup %3567  ;;  %v2342_v18 = vmul.f32 %v3566_v41, %v4700_v25  ;;  %v2424_v9 = vpop.permute.xlu0 %2423 }
 0x2d7   : > { %2594 = vmatprep.subr.bf16.mxu0 %v5058_v40  ;;  %3132 = vmatprep.subr.bf16.mxu1 %v5058_v40  ;;  %v2373_v38 = vpack.c.bf16 %v2344_v16, %v2343_v55  ;;  %v3570_v53 = vpop.eup %3569  ;;  %v2341_v30 = vmul.f32 %v3568_v56, %v4698_v0  ;;  %v3309_v0 = vld [vmem:[%s4974_s7] ss:$8 sps:$4 sm:$0xff]   ;;  %v3579_v56 = vld [vmem:[%s3858_s29 + $0x30] sm:$0xff] }
 0x2d8   : > { %v3572_v31 = vpop.eup %3571  ;;  %v2340_v57 = vmul.f32 %v3570_v53, %v4703_v54  ;;  %v3315_v54 = vld [vmem:[%s4974_s7 + $0x24] ss:$8 sps:$4 sm:$0xff]  }
 0x2d9   : > { %v2372_v44 = vpack.c.bf16 %v2342_v18, %v2341_v30  ;;  %v2339_v43 = vmul.f32 %v3572_v31, %v4719_v3  ;;  %v3317_v3 = vld [vmem:[%s4974_s7 + $0x20] ss:$8 sps:$4 sm:$0xff]   ;;  %v2429_v18 = vpop.permute.xlu1 %2428 }
 0x2da   : > { %2595 = vmatpush2.bf16.msra.mxu0 %v2373_v38  ;;  %3144 = vmatpush2.bf16.msra.mxu1 %v2373_v38 }
 0x2db   : > { %2596 = vmatprep.subr.bf16.mxu0 %v5058_v40  ;;  %3133 = vmatprep.subr.bf16.mxu1 %v5058_v40  ;;  %v2371_v25 = vpack.c.bf16 %v2340_v57, %v2339_v43  ;;  %v2434_v43 = vpop.permute.xlu0 %2433 }
 0x2de   : > { %2597 = vmatpush2.bf16.msra.mxu0 %v2372_v44  ;;  %3145 = vmatpush2.bf16.msra.mxu1 %v2372_v44  ;;  %v3580_v44 = vld [vmem:[%s3858_s29 + $0x38] sm:$0xff] }
 0x2df   : > { %2598 = vmatprep.subr.bf16.mxu0 %v5058_v40  ;;  %3134 = vmatprep.subr.bf16.mxu1 %v5058_v40  ;;  %v3318_v40 = vld [vmem:[%s4974_s7 + $0x34] ss:$8 sps:$4 sm:$0xff]  }
 0x2e2   : > { %2599 = vmatpush2.bf16.msra.mxu0 %v2371_v25  ;;  %3146 = vmatpush2.bf16.msra.mxu1 %v2371_v25 }
 0x2e5   : > { %2601 = vmatmul.mubr.bf16.vlgmr.msra.gmra.mxu0 %v3309_v0  ;;  %2609 = vmatmul.mubr.bf16.vlgmr.msra.gmra.mxu1 %v3312_v23 }
 0x2e6   : > { %2930 = vmatprep.mubr.msk.bf16.mxu1 %vm2543_vm4, %v3315_v54  ;;  %v3581_v54 = vld [vmem:[%s3858_s29 + $0x40] sm:$0xff] }
 0x2ed   : > { %2617 = vmatmul.mubr.bf16.gmra.mxu1 %v3317_v3 }
 0x2ee   : > { %2931 = vmatprep.mubr.msk.bf16.mxu1 %vm2543_vm4, %v3318_v40  ;;  %v2439_v40 = vpop.permute.xlu1 %2438 }
 0x2f5   : > { %2625 = vmatmul.mubr.bf16.gmra.mxu1 %v3320_v29 }
 0x2f6   : > { %2932 = vmatprep.mubr.msk.bf16.mxu1 %vm2543_vm4, %v3321_v19 }
 0x2fd   : > { %2633 = vmatmul.mubr.bf16.gmra.mxu1 %v3323_v60 }
 0x2fe   : > { %2933 = vmatprep.mubr.msk.bf16.mxu1 %vm2543_vm4, %v3324_v39  ;;  %v3582_v39 = vld [vmem:[%s3858_s29 + $0x48] sm:$0xff] }
 0x305   : > { %2641 = vmatmul.mubr.bf16.gmra.mxu1 %v3326_v4 }
 0x306   : > { %2934 = vmatprep.mubr.msk.bf16.mxu1 %vm2543_vm4, %v3327_v50  ;;  %v2444_v50 = vpop.permute.xlu0 %2443 }
 0x30d   : > { %2649 = vmatmul.mubr.bf16.gmra.mxu1 %v3329_v63 }
 0x30e   : > { %2935 = vmatprep.mubr.msk.bf16.mxu1 %vm2543_vm4, %v3330_v5 }
 0x315   : > { %2657 = vmatmul.mubr.bf16.gmra.mxu1 %v3332_v21 }
 0x3a5   : > { %v2602_v58 = vpop.f32.mrf.mxu0  ;;  %v2610_v11 = vpop.f32.mrf.mxu1 }
 0x3a6   : > { %v2603_v26 = vadd.f32 %v2602_v58, %v2394_v27  ;;  %v2611_v22 = vadd.f32 %v2610_v11, %v2404_v8  ;;  %v3583_v27 = vld [vmem:[%s3858_s29 + $0x50] sm:$0xff]  ;;  %v2449_v8 = vpop.permute.xlu1 %2448 }
 0x3a7   : > { %v2604_v36 = vpop.f32.mrf.mxu0  ;;  %v2612_v13 = vpop.f32.mrf.mxu1 }
 0x3a8   : > { %v2665_v7 = vadd.f32 %v3573_v20, %v2603_v26  ;;  %v2667_v62 = vadd.f32 %v3574_v1, %v2611_v22  ;;  %v3584_v22 = vld [vmem:[%s3858_s29 + $0x58] sm:$0xff]  ;;  %v2454_v13 = vpop.permute.xlu0 %2453  ;;  %v3585_v1 = vld [vmem:[%s3858_s29 + $0x60] sm:$0xff] }
 0x3a9   : > { %v2605_v52 = vpop.f32.mrf.mxu0  ;;  %v2613_v45 = vpop.f32.mrf.mxu1 }
 0x3aa   : > { %2681 = vst [vmem:[%s4884_s28] sm:$0xff] %v2665_v7  ;;  %2683 = vst [vmem:[%s4884_s28 + $0x10] sm:$0xff] %v2667_v62  ;;  %v2606_v49 = vadd.f32 %v2605_v52, %v2399_v24  ;;  %v2614_v59 = vadd.f32 %v2613_v45, %v2409_v2  ;;  %v2459_v52 = vpop.permute.xlu1 %2458 }
 0x3ab   : > { %v2615_v48 = vpop.f32.mrf.mxu1  ;;  %v2607_v33 = vpop.f32.mrf.mxu0 }
 0x3ac   : > { %v2666_v28 = vadd.f32 %v3575_v47, %v2606_v49  ;;  %v2668_v14 = vadd.f32 %v3576_v15, %v2614_v59  ;;  %v3586_v48 = vld [vmem:[%s3858_s29 + $0x68] sm:$0xff]  ;;  %v2464_v47 = vpop.permute.xlu0 %2463 }
 0x3ad   : > { %v2618_v12 = vpop.f32.mrf.mxu1 }
 0x3ae   : > { %2682 = vst [vmem:[%s4884_s28 + $0x8] sm:$0xff] %v2666_v28  ;;  %2684 = vst [vmem:[%s4884_s28 + $0x18] sm:$0xff] %v2668_v14  ;;  %v2619_v37 = vadd.f32 %v2618_v12, %v2414_v35  ;;  %v3587_v35 = vld [vmem:[%s3858_s29 + $0x70] sm:$0xff] }
 0x3af   : > { %v2620_v17 = vpop.f32.mrf.mxu1 }
 0x3b0   : > { %v2669_v42 = vadd.f32 %v3577_v6, %v2619_v37  ;;  %v2469_v37 = vpop.permute.xlu1 %2468 }
 0x3b1   : > { %v2621_v10 = vpop.f32.mrf.mxu1 }
 0x3b2   : > { %2685 = vst [vmem:[%s4884_s28 + $0x20] sm:$0xff] %v2669_v42  ;;  %v2622_v61 = vadd.f32 %v2621_v10, %v2419_v32  ;;  %v3588_v32 = vld [vmem:[%s3858_s29 + $0x78] sm:$0xff] }
 0x3b3   : > { %v2623_v46 = vpop.f32.mrf.mxu1 }
 0x3b4   : > { %v2670_v51 = vadd.f32 %v3578_v34, %v2622_v61 }
 0x3b5   : > { %v2626_v41 = vpop.f32.mrf.mxu1 }
 0x3b6   : > { %2686 = vst [vmem:[%s4884_s28 + $0x28] sm:$0xff] %v2670_v51  ;;  %v2627_v16 = vadd.f32 %v2626_v41, %v2424_v9 }
 0x3b7   : > { %v2628_v55 = vpop.f32.mrf.mxu1 }
 0x3b8   : > { %v2671_v38 = vadd.f32 %v3579_v56, %v2627_v16 }
 0x3b9   : > { %v2629_v53 = vpop.f32.mrf.mxu1 }
 0x3ba   : > { %2687 = vst [vmem:[%s4884_s28 + $0x30] sm:$0xff] %v2671_v38  ;;  %v2630_v30 = vadd.f32 %v2629_v53, %v2429_v18 }
 0x3bb   : > { %v2631_v31 = vpop.f32.mrf.mxu1 }
 0x3bc   : > { %v2672_v57 = vadd.f32 %v3580_v44, %v2630_v30 }
 0x3bd   : > { %v2634_v25 = vpop.f32.mrf.mxu1 }
 0x3be   : > { %2688 = vst [vmem:[%s4884_s28 + $0x38] sm:$0xff] %v2672_v57  ;;  %v2635_v0 = vadd.f32 %v2634_v25, %v2434_v43 }
 0x3bf   : > { %v2636_v23 = vpop.f32.mrf.mxu1 }
 0x3c0   : > { %v2673_v3 = vadd.f32 %v3581_v54, %v2635_v0 }
 0x3c1   : > { %v2637_v29 = vpop.f32.mrf.mxu1 }
 0x3c2   : > { %2689 = vst [vmem:[%s4884_s28 + $0x40] sm:$0xff] %v2673_v3  ;;  %v2638_v19 = vadd.f32 %v2637_v29, %v2439_v40 }
 0x3c3   : > { %v2639_v60 = vpop.f32.mrf.mxu1 }
 0x3c4   : > { %v2674_v4 = vadd.f32 %v3582_v39, %v2638_v19 }
 0x3c5   : > { %v2642_v63 = vpop.f32.mrf.mxu1 }
 0x3c6   : > { %2690 = vst [vmem:[%s4884_s28 + $0x48] sm:$0xff] %v2674_v4  ;;  %v2643_v5 = vadd.f32 %v2642_v63, %v2444_v50 }
 0x3c7   : > { %v2644_v21 = vpop.f32.mrf.mxu1 }
 0x3c8   : > { %v2675_v24 = vadd.f32 %v3583_v27, %v2643_v5 }
 0x3c9   : > { %v2645_v58 = vpop.f32.mrf.mxu1 }
 0x3ca   : > { %2691 = vst [vmem:[%s4884_s28 + $0x50] sm:$0xff] %v2675_v24  ;;  %v2646_v11 = vadd.f32 %v2645_v58, %v2449_v8 }
 0x3cb   : > { %v2647_v26 = vpop.f32.mrf.mxu1 }
 0x3cc   : > { %v2676_v36 = vadd.f32 %v3584_v22, %v2646_v11 }
 0x3cd   : > { %v2650_v2 = vpop.f32.mrf.mxu1 }
 0x3ce   : > { %2692 = vst [vmem:[%s4884_s28 + $0x58] sm:$0xff] %v2676_v36  ;;  %v2651_v20 = vadd.f32 %v2650_v2, %v2454_v13 }
 0x3cf   : > { %v2652_v7 = vpop.f32.mrf.mxu1 }
 0x3d0   : > { %v2677_v62 = vadd.f32 %v3585_v1, %v2651_v20 }
 0x3d1   : > { %v2653_v45 = vpop.f32.mrf.mxu1 }
 0x3d2   : > { %2693 = vst [vmem:[%s4884_s28 + $0x60] sm:$0xff] %v2677_v62  ;;  %v2654_v49 = vadd.f32 %v2653_v45, %v2459_v52 }
 0x3d3   : > { %v2655_v59 = vpop.f32.mrf.mxu1 }
 0x3d4   : > { %v2678_v33 = vadd.f32 %v3586_v48, %v2654_v49 }
 0x3d5   : > { %v2658_v28 = vpop.f32.mrf.mxu1 }
 0x3d6   : > { %2694 = vst [vmem:[%s4884_s28 + $0x68] sm:$0xff] %v2678_v33  ;;  %v2659_v15 = vadd.f32 %v2658_v28, %v2464_v47 }
 0x3d7   : > { %v2660_v14 = vpop.f32.mrf.mxu1 }
 0x3d8   : > { %v2679_v12 = vadd.f32 %v3587_v35, %v2659_v15 }
 0x3d9   : > { %v2661_v17 = vpop.f32.mrf.mxu1 }
 0x3da   : > { %2695 = vst [vmem:[%s4884_s28 + $0x70] sm:$0xff] %v2679_v12  ;;  %v2662_v6 = vadd.f32 %v2661_v17, %v2469_v37 }
 0x3db   : > { %v2663_v42 = vpop.f32.mrf.mxu1 }
 0x3dc   : > { %v2680_v10 = vadd.f32 %v3588_v32, %v2662_v6 }
 0x3de   : > { %2696 = vst [vmem:[%s4884_s28 + $0x78] sm:$0xff] %v2680_v10 }
 0x3df   : > { %3602 = shalt.err (!%p3599_p3)
}
 0x3e0   : > { %s3603_s29 = scalar_lea.hbm %s4919_s17, 2048  ;;  %s3607_s28 = scalar_lea.hbm %s4976_s9, 4096 }
 0x3e1   : > { %p3604_p4 = scmp.ne.s32.totalorder %s4919_s17, %s3603_s29  ;;  %p3608_p9 = scmp.lt.s32.totalorder %s4919_s17, %s4976_s9 }
 0x3e2   : > { %p3609_p10 = scmp.lt.s32.totalorder %s3607_s28, %s3603_s29 }
 0x3e3   : > { %p3605_p7 = pnand %p3604_p4, %p3745_p5 }
 0x3e4   : > { %p3610_p11 = por %p3609_p10, %p3608_p9 }
 0x3e5   : > { %p3606_p8 = pneg %p3605_p7 }
 0x3e7   : > { %p3611_p12 = pnand %p3610_p11, %p3606_p8 }
 0x3e9   : > { %3614 = shalt.err (!%p3611_p12)
}
 0x3ea   : > { %s3655_s0 = smov 128   ;;  %s3656_s21 = smov 8  }
 0x3eb   : > { %3147 = dma.vmem_to_hbm [thread:$0]  (%p3745_p5), %s4921_s16, 2048, %s4919_s17, %s4927_s13, %s3655_s0, %s3655_s0, %s3656_s21  }
 0x3ec PF: > { %p3153_p13 = scmp.ge.s32.totalorder %s3649_s12, 2  ;;  %s2726_s23 = sand.u32 1, %s3637_s30  }
 0x3ed   : > { %s2727_s24 = scalar_lea.sflag [#allocation3], %s2726_s23 }
 0x3ee   : > { %p3150_p0 = pnand %p3153_p13, %p3749_p6 }
 0x3f0   : > { %p3151_p1 = pneg %p3150_p0 }
 0x3f2   : > { %3632 = dma.done.wait (%p3151_p1), %s2727_s24, 2048  }
 0x3f3   : > { %3634 = vsyncadd (%p3151_p1), %s2727_s24, 4294965248  ;;  %p19_p2 = scmp.ge.s32.totalorder %s3732_s15, 4   ;;  %s5060_s30 = smov %s3641_s10 }
 0x3f4   : > { %s5061_s10 = smov %s3645_s11  ;;  %s5062_s11 = smov %s3743_s18 }
 0x3f5   : > { %s5063_s12 = smov %s3732_s15  ;;  %21 = sbr.rel (!%p19_p2) target bundleno = 5 (0x5), region = 93 }
 0x3fa   :  { %2732 = vsyncpa [#allocation3], 1 }
 0x3fb   :  { %2734 = vsyncpa [#allocation3 + $0x1], 1 }

</bundles_post_ra>
